<compile_context>
chip_gen: v6e
topology: v6e:2x2x1
jax: 0.10.0
libtpu: 0.0.40
codegen_flags: <defaults>
</compile_context>

<pallas_src>
import functools

import jax
import jax.numpy as jnp
from jax import lax
from jax.experimental import pallas as pl
from jax.experimental.pallas import tpu as pltpu


def pointer_decoder_kernel(
    # inputs
    enc_ref, abias_ref, cidx_ref, emb_ref, tgt_ref, h0_ref, c0_ref,
    wlstm_ref, blstm_ref,        # fused LSTM weight (E+H, 4H) bf16, bias (1, 4H)
    WhW_ref, encb_ref,           # Wh weight (2H, 2H) bf16, folded bias (1, 2H)
    WsW_ref,                     # Ws weight (H, 2H) bf16 (bias folded into encb)
    wcW_ref,                     # w_c weight as a (1, 2H) row (bias folded into encb)
    vW_ref,                      # v weight as (1, 2H) row (v_b folded into abias)
    VW_ref, VB_ref,              # V weight (3H, Vocab) bf16, bias (1, Vocab)
    whW_ref, wsW_ref, wxW_ref,   # p_gen rows: (1,2H), (1,H), (1,E)
    pgB_ref,                     # summed p_gen bias (1, 1)
    # output
    out_ref,                     # (B, 2): col 0 = lm-loss sum, col 1 = coverage-loss sum
    # scratch
    h_sc, c_sc, cover_sc, encproj_sc, lm_sc, covl_sc,
    *, H):
    s = pl.program_id(0)
    B, T_enc, enc2h = enc_ref.shape
    Vocab = VW_ref.shape[1]
    f32 = jnp.float32
    bf16 = jnp.bfloat16

    # ---- step 0: init state, coverage, loss accumulators, encoder projection
    @pl.when(s == 0)
    def _():
        h_sc[...] = h0_ref[...]
        c_sc[...] = c0_ref[...]
        cover_sc[...] = jnp.zeros_like(cover_sc)
        lm_sc[...] = jnp.zeros_like(lm_sc)
        covl_sc[...] = jnp.zeros_like(covl_sc)
        enc2d = enc_ref[...].reshape(B * T_enc, enc2h)           # bf16
        ep = jnp.dot(enc2d, WhW_ref[...],
                     preferred_element_type=f32) + encb_ref[...]  # Wh_b+Ws_b+wc_b folded
        encproj_sc[...] = ep.reshape(B, T_enc, enc2h).astype(encproj_sc.dtype)

    # ---- LSTM cell (PyTorch gate order i, f, g, o), fused [x, h] matmul
    x_t = emb_ref[...]                    # (B, E) f32, blocked per decode step
    tgt = tgt_ref[...]                    # (B, 1) int32, blocked per decode step
    h_prev = h_sc[...]
    c_prev = c_sc[...]
    xh = jnp.concatenate([x_t, h_prev], axis=1)                   # (B, E+H)
    gates = (jnp.dot(xh.astype(bf16), wlstm_ref[...],
                     preferred_element_type=f32) + blstm_ref[...])
    i_g = jax.nn.sigmoid(gates[:, 0:H])
    f_g = jax.nn.sigmoid(gates[:, H:2 * H])
    g_g = jnp.tanh(gates[:, 2 * H:3 * H])
    o_g = jax.nn.sigmoid(gates[:, 3 * H:4 * H])
    c_t = f_g * c_prev + i_g * g_g
    h_t = o_g * jnp.tanh(c_t)
    h_sc[...] = h_t
    c_sc[...] = c_t

    # ---- attention with coverage (linear biases already folded into encproj_sc /
    #      abias_ref; PAD masking folded into abias_ref as a -1e30 additive term)
    dec_proj = jnp.dot(h_t.astype(bf16), WsW_ref[...],
                       preferred_element_type=f32)                # (B, 2H)
    cover = cover_sc[...]                                          # (B, T)
    cov_proj = cover[:, :, None] * wcW_ref[...][None, :, :]        # (B, T, 2H)
    feat = jnp.tanh(encproj_sc[...].astype(f32)
                    + dec_proj[:, None, :] + cov_proj)             # (B, T, 2H)
    e_t = jnp.sum(feat * vW_ref[...][None, :, :], axis=2)          # (B, T)

    scores = e_t + abias_ref[...]                                  # + v_b, -1e30 on PAD
    m_a = jnp.max(scores, axis=1, keepdims=True)
    ex = jnp.exp(scores - m_a)
    attn = ex * pl.reciprocal(jnp.sum(ex, axis=1, keepdims=True), approx=True)

    # context on the MXU: batched (1, T) @ (T, 2H)
    context = jnp.einsum('bqt,btd->bqd',
                         attn[:, None, :].astype(bf16), enc_ref[...],
                         preferred_element_type=f32).reshape(B, enc2h)   # (B, 2H)

    # ---- vocabulary logits & generation prob
    hc = jnp.concatenate([h_t, context], axis=1)                   # (B, 3H)
    logits = jnp.dot(hc.astype(bf16), VW_ref[...],
                     preferred_element_type=f32) + VB_ref[...]     # (B, Vocab)
    p_gen = jax.nn.sigmoid(
        jnp.sum(context * whW_ref[...], axis=1, keepdims=True)
        + jnp.sum(h_t * wsW_ref[...], axis=1, keepdims=True)
        + jnp.sum(x_t * wxW_ref[...], axis=1, keepdims=True)
        + pgB_ref[...])                                            # (B, 1)

    # ---- NLL: evaluate the combined (generation + copy) distribution ONLY at the
    #      target index — no (B, V_ext) scatter/gather materialization.
    tgt_mask = (tgt != 0).astype(f32)                              # (B, 1)
    g_idx = jnp.where(tgt == 0, 0, tgt - 1)                        # (B, 1)

    m_v = jnp.max(logits, axis=1, keepdims=True)
    ex_v = jnp.exp(logits - m_v)
    inv_se = pl.reciprocal(jnp.sum(ex_v, axis=1, keepdims=True), approx=True)
    voc_iota = lax.broadcasted_iota(jnp.int32, (B, Vocab), 1)
    tgt_exp = jnp.sum(jnp.where(voc_iota == g_idx, ex_v, 0.0),
                      axis=1, keepdims=True)                       # exp(logit[tgt]-max)
    # tgt_exp == 0 automatically for OOV targets (g_idx >= Vocab) -> gen part 0.
    gen_part = p_gen * tgt_exp * inv_se                            # p_gen * p_vocab[tgt]

    copy_sum = jnp.sum(jnp.where(cidx_ref[...] == g_idx, attn, 0.0),
                       axis=1, keepdims=True)                      # (B, 1)
    picked = gen_part + (1.0 - p_gen) * copy_sum
    # Note: no epsilon inside the log, matching the original module exactly.
    lm_sc[...] += -jnp.log(picked) * tgt_mask

    # ---- coverage update & coverage loss (exactly as written in the module)
    cover_new = cover + attn
    cover_sc[...] = cover_new
    covl_sc[...] += jnp.sum(jnp.minimum(cover_new, attn), axis=1, keepdims=True)

    # ---- single output write at the last decode step (no per-step HBM-bound stores)
    @pl.when(s == pl.num_programs(0) - 1)
    def _():
        out_ref[...] = jnp.concatenate([lm_sc[...], covl_sc[...]], axis=1)


def _full_spec(shape):
    nd = len(shape)
    return pl.BlockSpec(shape, lambda s, _nd=nd: (0,) * _nd)


def pointer_attention_decoder_loss(params, enc_states, enc_final_state, enc_mask,
                                   dec_input, article_inds, targets,
                                   max_article_oov, lmbda=1.0):
    """Training-mode forward pass (decode=False) of PointerAttentionDecoder."""
    del max_article_oov  # extended-vocab size not needed (no dense scatter)
    B, T_enc, enc_size = enc_states.shape
    T_dec = dec_input.shape[1]
    H = params["hidden_size"]
    E = params["input_size"]
    assert enc_size == 2 * H

    f32 = jnp.float32
    bf16 = jnp.bfloat16

    # glue: embedding lookup, layout prep, weight fusion / bias folding / bf16 casts
    embed = params["embedding"][dec_input]                          # (B, T_dec, E)
    emb_tm = jnp.transpose(embed, (1, 0, 2)).astype(f32)            # (T_dec, B, E)
    tgt_tm = jnp.transpose(targets, (1, 0))[:, :, None].astype(jnp.int32)  # (T_dec, B, 1)
    dec_lens = jnp.sum((dec_input > 0).astype(f32), axis=1)
    h0, c0 = enc_final_state

    # Hoisted out of the decode loop (amortized over T_dec steps):
    #  * additive attention bias = v_b everywhere, -1e30 at PAD positions
    #  * copy indices = article_inds - 1, with PAD positions -> 0 (as in the module)
    attn_bias = (jnp.where(enc_mask, -1e30, 0.0).astype(f32)
                 + params["v_b"].reshape(1, 1))                     # (B, T_enc)
    copy_idx = jnp.where(enc_mask, 0,
                         article_inds.astype(jnp.int32) - 1)        # (B, T_enc)

    w_lstm = jnp.concatenate([params["w_ih"], params["w_hh"]], axis=0).astype(bf16)
    enc_bias = (params["Wh_b"] + params["Ws_b"] + params["wc_b"]).astype(f32)
    pg_b = (params["wh_b"] + params["ws_b"] + params["wx_b"]).astype(f32)

    in_arrays = [
        enc_states.astype(bf16), attn_bias.astype(f32), copy_idx.astype(jnp.int32),
        emb_tm, tgt_tm, h0.astype(f32), c0.astype(f32),
        w_lstm, params["b_lstm"].astype(f32),
        params["Wh_w"].astype(bf16), enc_bias,
        params["Ws_w"].astype(bf16),
        params["wc_w"].astype(f32),
        params["v_w"].astype(f32),
        params["V_w"].astype(bf16), params["V_b"].astype(f32),
        params["wh_w"].astype(f32), params["ws_w"].astype(f32),
        params["wx_w"].astype(f32), pg_b,
    ]

    in_specs = []
    for i, a in enumerate(in_arrays):
        if i == 3:    # emb_tm: block one decode step, pipeline-prefetch the next
            in_specs.append(pl.BlockSpec((None, B, E), lambda s: (s, 0, 0)))
        elif i == 4:  # tgt_tm: block one decode step
            in_specs.append(pl.BlockSpec((None, B, 1), lambda s: (s, 0, 0)))
        else:
            in_specs.append(_full_spec(a.shape))

    out_shape = jax.ShapeDtypeStruct((B, 2), f32)
    out_specs = pl.BlockSpec((B, 2), lambda s: (0, 0))
    scratch = [
        pltpu.VMEM((B, H), f32),               # LSTM h state
        pltpu.VMEM((B, H), f32),               # LSTM c state
        pltpu.VMEM((B, T_enc), f32),           # coverage
        pltpu.VMEM((B, T_enc, 2 * H), bf16),   # encoder projection (+ folded biases)
        pltpu.VMEM((B, 1), f32),               # lm-loss accumulator
        pltpu.VMEM((B, 1), f32),               # coverage-loss accumulator
    ]

    kernel = functools.partial(pointer_decoder_kernel, H=H)
    res = pl.pallas_call(
        kernel,
        out_shape=out_shape,
        grid_spec=pltpu.PrefetchScalarGridSpec(
            num_scalar_prefetch=0,
            grid=(T_dec,),
            in_specs=in_specs,
            out_specs=out_specs,
            scratch_shapes=scratch),
        compiler_params=pltpu.CompilerParams(
            dimension_semantics=("arbitrary",)),   # decode steps carry a recurrence
    )(*in_arrays)

    lm_sum = res[:, 0]
    cov_sum = res[:, 1]
    total = (lm_sum + lmbda * cov_sum) / dec_lens
    return total


def init_params(key, input_size, hidden_size, vocab_size):
    H, E, V = hidden_size, input_size, vocab_size
    ks = jax.random.split(key, 24)
    n = lambda k, shape: (0.1 * jax.random.normal(k, shape)).astype(jnp.float32)
    params = dict(
        hidden_size=H, input_size=E, vocab_size=V,
        embedding=n(ks[0], (V, E)),
        # LSTM (weights stored transposed to (in, 4H); b = b_ih + b_hh)
        w_ih=n(ks[1], (E, 4 * H)),
        w_hh=n(ks[2], (H, 4 * H)),
        b_lstm=n(ks[3], (1, 4 * H)),
        # Wh: Linear(2H, 2H)
        Wh_w=n(ks[4], (2 * H, 2 * H)), Wh_b=n(ks[5], (1, 2 * H)),
        # Ws: Linear(H, 2H)
        Ws_w=n(ks[6], (H, 2 * H)), Ws_b=n(ks[7], (1, 2 * H)),
        # w_c: Linear(1, 2H)  (stored as (1, 2H))
        wc_w=n(ks[8], (1, 2 * H)), wc_b=n(ks[9], (1, 2 * H)),
        # v: Linear(2H, 1)    (weight stored as (1, 2H))
        v_w=n(ks[10], (1, 2 * H)), v_b=n(ks[11], (1, 1)),
        # V: Linear(3H, vocab)
        V_w=n(ks[12], (3 * H, V)), V_b=n(ks[13], (1, V)),
        # w_h: Linear(2H, 1), w_s: Linear(H, 1), w_x: Linear(E, 1)
        wh_w=n(ks[14], (1, 2 * H)), wh_b=n(ks[15], (1, 1)),
        ws_w=n(ks[16], (1, H)), ws_b=n(ks[17], (1, 1)),
        wx_w=n(ks[18], (1, E)), wx_b=n(ks[19], (1, 1)),
    )
    return params


if __name__ == "__main__":
    B, T_enc, T_dec = 2, 8, 6
    H, E, VOCAB, OOV = 16, 16, 32, 4

    key = jax.random.PRNGKey(0)
    kp, k1, k2, k3, k4, k5, k6, k7 = jax.random.split(key, 8)

    params = init_params(kp, input_size=E, hidden_size=H, vocab_size=VOCAB)

    enc_states = jax.random.normal(k1, (B, T_enc, 2 * H), jnp.float32)
    enc_final_state = (jax.random.normal(k2, (B, H), jnp.float32),
                       jax.random.normal(k3, (B, H), jnp.float32))
    # PAD mask: batch 0 has full length, batch 1 has last 3 positions padded
    lengths = jnp.array([T_enc, T_enc - 3], jnp.int32)
    enc_mask = (jnp.arange(T_enc)[None, :] >= lengths[:, None])          # (B, T_enc) bool
    dec_input = jax.random.randint(k4, (B, T_dec), 1, VOCAB)             # decoder inputs (>0)
    article_inds = jax.random.randint(k5, (B, T_enc), 1, VOCAB + OOV + 1)
    targets = jax.random.randint(k6, (B, T_dec), 1, VOCAB + OOV + 1)
    targets = targets.at[1, -1].set(0)                                    # one pad target

    loss = pointer_attention_decoder_loss(
        params, enc_states, enc_final_state, enc_mask,
        dec_input, article_inds, targets,
        max_article_oov=OOV, lmbda=1.0)
    loss = jax.block_until_ready(loss)
    assert loss.shape == (B,)
    print("KERNEL_OK")
</pallas_src>

<mosaic_0001>
module attributes {stable_mosaic.version = 11 : i64} {
  func.func @pointer_decoder_kernel(%arg0: i32, %arg1: memref<2x8x32xbf16, #tpu.memory_space<vmem>>, %arg2: memref<2x8xf32, #tpu.memory_space<vmem>>, %arg3: memref<2x8xi32, #tpu.memory_space<vmem>>, %arg4: memref<1x2x16xf32, #tpu.memory_space<vmem>>, %arg5: memref<1x2x1xi32, #tpu.memory_space<vmem>>, %arg6: memref<2x16xf32, #tpu.memory_space<vmem>>, %arg7: memref<2x16xf32, #tpu.memory_space<vmem>>, %arg8: memref<32x64xbf16, #tpu.memory_space<vmem>>, %arg9: memref<1x64xf32, #tpu.memory_space<vmem>>, %arg10: memref<32x32xbf16, #tpu.memory_space<vmem>>, %arg11: memref<1x32xf32, #tpu.memory_space<vmem>>, %arg12: memref<16x32xbf16, #tpu.memory_space<vmem>>, %arg13: memref<1x32xf32, #tpu.memory_space<vmem>>, %arg14: memref<1x32xf32, #tpu.memory_space<vmem>>, %arg15: memref<48x32xbf16, #tpu.memory_space<vmem>>, %arg16: memref<1x32xf32, #tpu.memory_space<vmem>>, %arg17: memref<1x32xf32, #tpu.memory_space<vmem>>, %arg18: memref<1x16xf32, #tpu.memory_space<vmem>>, %arg19: memref<1x16xf32, #tpu.memory_space<vmem>>, %arg20: memref<1x1xf32, #tpu.memory_space<vmem>>, %arg21: memref<2x2xf32, #tpu.memory_space<vmem>>, %arg22: memref<2x16xf32, #tpu.memory_space<vmem>>, %arg23: memref<2x16xf32, #tpu.memory_space<vmem>>, %arg24: memref<2x8xf32, #tpu.memory_space<vmem>>, %arg25: memref<2x8x32xbf16, #tpu.memory_space<vmem>>, %arg26: memref<2x1xf32, #tpu.memory_space<vmem>>, %arg27: memref<2x1xf32, #tpu.memory_space<vmem>>) attributes {dimension_semantics = [#tpu.dimension_semantics<arbitrary>], iteration_bounds = array<i64: 6>, scalar_prefetch = 0 : i64, scratch_operands = 6 : i64, tpu.core_type = #tpu.core_type<tc>, window_params = [{pipeline_mode = #tpu.pipeline_mode<synchronous>, transform_indices = @transform_0, window_bounds = array<i64: 2, 8, 32>}, {pipeline_mode = #tpu.pipeline_mode<synchronous>, transform_indices = @transform_1, window_bounds = array<i64: 2, 8>}, {pipeline_mode = #tpu.pipeline_mode<synchronous>, transform_indices = @transform_2, window_bounds = array<i64: 2, 8>}, {transform_indices = @transform_3, window_bounds = array<i64: 1, 2, 16>}, {transform_indices = @transform_4, window_bounds = array<i64: 1, 2, 1>}, {pipeline_mode = #tpu.pipeline_mode<synchronous>, transform_indices = @transform_5, window_bounds = array<i64: 2, 16>}, {pipeline_mode = #tpu.pipeline_mode<synchronous>, transform_indices = @transform_6, window_bounds = array<i64: 2, 16>}, {pipeline_mode = #tpu.pipeline_mode<synchronous>, transform_indices = @transform_7, window_bounds = array<i64: 32, 64>}, {pipeline_mode = #tpu.pipeline_mode<synchronous>, transform_indices = @transform_8, window_bounds = array<i64: 1, 64>}, {pipeline_mode = #tpu.pipeline_mode<synchronous>, transform_indices = @transform_9, window_bounds = array<i64: 32, 32>}, {pipeline_mode = #tpu.pipeline_mode<synchronous>, transform_indices = @transform_10, window_bounds = array<i64: 1, 32>}, {pipeline_mode = #tpu.pipeline_mode<synchronous>, transform_indices = @transform_11, window_bounds = array<i64: 16, 32>}, {pipeline_mode = #tpu.pipeline_mode<synchronous>, transform_indices = @transform_12, window_bounds = array<i64: 1, 32>}, {pipeline_mode = #tpu.pipeline_mode<synchronous>, transform_indices = @transform_13, window_bounds = array<i64: 1, 32>}, {pipeline_mode = #tpu.pipeline_mode<synchronous>, transform_indices = @transform_14, window_bounds = array<i64: 48, 32>}, {pipeline_mode = #tpu.pipeline_mode<synchronous>, transform_indices = @transform_15, window_bounds = array<i64: 1, 32>}, {pipeline_mode = #tpu.pipeline_mode<synchronous>, transform_indices = @transform_16, window_bounds = array<i64: 1, 32>}, {pipeline_mode = #tpu.pipeline_mode<synchronous>, transform_indices = @transform_17, window_bounds = array<i64: 1, 16>}, {pipeline_mode = #tpu.pipeline_mode<synchronous>, transform_indices = @transform_18, window_bounds = array<i64: 1, 16>}, {pipeline_mode = #tpu.pipeline_mode<synchronous>, transform_indices = @transform_19, window_bounds = array<i64: 1, 1>}, {pipeline_mode = #tpu.pipeline_mode<synchronous>, transform_indices = @transform_20, window_bounds = array<i64: 2, 2>}]} {
    %c0_i32 = arith.constant 0 : i32
    %0 = arith.cmpi eq, %arg0, %c0_i32 : i32
    %1 = arith.extui %0 : i1 to i32
    %c0_i32_0 = arith.constant 0 : i32
    %2 = arith.cmpi ne, %1, %c0_i32_0 : i32
    scf.if %2 {
      %c0_84 = arith.constant 0 : index
      %c0_85 = arith.constant 0 : index
      %170 = vector.load %arg6[%c0_84, %c0_85] : memref<2x16xf32, #tpu.memory_space<vmem>>, vector<2x16xf32>
      %c0_86 = arith.constant 0 : index
      %c0_87 = arith.constant 0 : index
      %171 = vector.load %arg22[%c0_86, %c0_87] : memref<2x16xf32, #tpu.memory_space<vmem>>, vector<2x16xf32>
      tpu.vector_store %arg22[%c0_86, %c0_87], %170 {strides = array<i32>} : memref<2x16xf32, #tpu.memory_space<vmem>>, vector<2x16xf32>,
      %c0_88 = arith.constant 0 : index
      %c0_89 = arith.constant 0 : index
      %172 = vector.load %arg7[%c0_88, %c0_89] : memref<2x16xf32, #tpu.memory_space<vmem>>, vector<2x16xf32>
      %c0_90 = arith.constant 0 : index
      %c0_91 = arith.constant 0 : index
      %173 = vector.load %arg23[%c0_90, %c0_91] : memref<2x16xf32, #tpu.memory_space<vmem>>, vector<2x16xf32>
      tpu.vector_store %arg23[%c0_90, %c0_91], %172 {strides = array<i32>} : memref<2x16xf32, #tpu.memory_space<vmem>>, vector<2x16xf32>,
      %cst_92 = arith.constant 0.000000e+00 : f32
      %174 = vector.broadcast %cst_92 : f32 to vector<2x8xf32>
      %c0_93 = arith.constant 0 : index
      %c0_94 = arith.constant 0 : index
      %175 = vector.load %arg24[%c0_93, %c0_94] : memref<2x8xf32, #tpu.memory_space<vmem>>, vector<2x8xf32>
      tpu.vector_store %arg24[%c0_93, %c0_94], %174 {strides = array<i32>} : memref<2x8xf32, #tpu.memory_space<vmem>>, vector<2x8xf32>,
      %cst_95 = arith.constant 0.000000e+00 : f32
      %176 = vector.broadcast %cst_95 : f32 to vector<2x1xf32>
      %c0_96 = arith.constant 0 : index
      %c0_97 = arith.constant 0 : index
      %177 = vector.load %arg26[%c0_96, %c0_97] : memref<2x1xf32, #tpu.memory_space<vmem>>, vector<2x1xf32>
      tpu.vector_store %arg26[%c0_96, %c0_97], %176 {strides = array<i32>} : memref<2x1xf32, #tpu.memory_space<vmem>>, vector<2x1xf32>,
      %cst_98 = arith.constant 0.000000e+00 : f32
      %178 = vector.broadcast %cst_98 : f32 to vector<2x1xf32>
      %c0_99 = arith.constant 0 : index
      %c0_100 = arith.constant 0 : index
      %179 = vector.load %arg27[%c0_99, %c0_100] : memref<2x1xf32, #tpu.memory_space<vmem>>, vector<2x1xf32>
      tpu.vector_store %arg27[%c0_99, %c0_100], %178 {strides = array<i32>} : memref<2x1xf32, #tpu.memory_space<vmem>>, vector<2x1xf32>,
      %c0_101 = arith.constant 0 : index
      %c0_102 = arith.constant 0 : index
      %c0_103 = arith.constant 0 : index
      %180 = vector.load %arg1[%c0_101, %c0_102, %c0_103] : memref<2x8x32xbf16, #tpu.memory_space<vmem>>, vector<2x8x32xbf16>
      %181 = vector.shape_cast %180 : vector<2x8x32xbf16> to vector<16x32xbf16>
      %c0_104 = arith.constant 0 : index
      %c0_105 = arith.constant 0 : index
      %182 = vector.load %arg10[%c0_104, %c0_105] : memref<32x32xbf16, #tpu.memory_space<vmem>>, vector<32x32xbf16>
      %cst_106 = arith.constant dense<0.000000e+00> : vector<16x32xf32>
      %183 = tpu.matmul %181, %182, %cst_106 {dimension_numbers = #tpu.dot_dimension_numbers<[1], [0], [0], [1], [0, 0, 1, 1], [], []>} : vector<16x32xbf16>, vector<32x32xbf16>, vector<16x32xf32> -> vector<16x32xf32>
      %c0_107 = arith.constant 0 : index
      %c0_108 = arith.constant 0 : index
      %184 = vector.load %arg11[%c0_107, %c0_108] : memref<1x32xf32, #tpu.memory_space<vmem>>, vector<1x32xf32>
      %185 = vector.broadcast %184 : vector<1x32xf32> to vector<16x32xf32>
      %186 = arith.addf %183, %185 : vector<16x32xf32>
      %187 = vector.shape_cast %186 : vector<16x32xf32> to vector<2x8x32xf32>
      %188 = arith.truncf %187 : vector<2x8x32xf32> to vector<2x8x32xbf16>
      %c0_109 = arith.constant 0 : index
      %c0_110 = arith.constant 0 : index
      %c0_111 = arith.constant 0 : index
      %189 = vector.load %arg25[%c0_109, %c0_110, %c0_111] : memref<2x8x32xbf16, #tpu.memory_space<vmem>>, vector<2x8x32xbf16>
      tpu.vector_store %arg25[%c0_109, %c0_110, %c0_111], %188 {strides = array<i32>} : memref<2x8x32xbf16, #tpu.memory_space<vmem>>, vector<2x8x32xbf16>,
    } else {
    }
    %c0 = arith.constant 0 : index
    %c0_1 = arith.constant 0 : index
    %c0_2 = arith.constant 0 : index
    %3 = vector.load %arg4[%c0, %c0_1, %c0_2] : memref<1x2x16xf32, #tpu.memory_space<vmem>>, vector<1x2x16xf32>
    %4 = vector.shape_cast %3 : vector<1x2x16xf32> to vector<2x16xf32>
    %c0_3 = arith.constant 0 : index
    %c0_4 = arith.constant 0 : index
    %c0_5 = arith.constant 0 : index
    %5 = vector.load %arg5[%c0_3, %c0_4, %c0_5] : memref<1x2x1xi32, #tpu.memory_space<vmem>>, vector<1x2x1xi32>
    %6 = vector.shape_cast %5 : vector<1x2x1xi32> to vector<2x1xi32>
    %c0_6 = arith.constant 0 : index
    %c0_7 = arith.constant 0 : index
    %7 = vector.load %arg22[%c0_6, %c0_7] : memref<2x16xf32, #tpu.memory_space<vmem>>, vector<2x16xf32>
    %c0_8 = arith.constant 0 : index
    %c0_9 = arith.constant 0 : index
    %8 = vector.load %arg23[%c0_8, %c0_9] : memref<2x16xf32, #tpu.memory_space<vmem>>, vector<2x16xf32>
    %9 = tpu.concatenate %4, %7 in 1 : vector<2x16xf32>, vector<2x16xf32> -> vector<2x32xf32>
    %10 = arith.truncf %9 : vector<2x32xf32> to vector<2x32xbf16>
    %c0_10 = arith.constant 0 : index
    %c0_11 = arith.constant 0 : index
    %11 = vector.load %arg8[%c0_10, %c0_11] : memref<32x64xbf16, #tpu.memory_space<vmem>>, vector<32x64xbf16>
    %cst = arith.constant dense<0.000000e+00> : vector<2x64xf32>
    %12 = tpu.matmul %10, %11, %cst {dimension_numbers = #tpu.dot_dimension_numbers<[1], [0], [0], [1], [0, 0, 1, 1], [], []>} : vector<2x32xbf16>, vector<32x64xbf16>, vector<2x64xf32> -> vector<2x64xf32>
    %c0_12 = arith.constant 0 : index
    %c0_13 = arith.constant 0 : index
    %13 = vector.load %arg9[%c0_12, %c0_13] : memref<1x64xf32, #tpu.memory_space<vmem>>, vector<1x64xf32>
    %14 = vector.broadcast %13 : vector<1x64xf32> to vector<2x64xf32>
    %15 = arith.addf %12, %14 : vector<2x64xf32>
    %16 = vector.extract_strided_slice %15 {offsets = [0, 0], sizes = [2, 16], strides = [1, 1]} : vector<2x64xf32> to vector<2x16xf32>
    %17 = arith.negf %16 : vector<2x16xf32>
    %18 = math.exp %17 : vector<2x16xf32>
    %cst_14 = arith.constant 1.000000e+00 : f32
    %19 = vector.broadcast %cst_14 : f32 to vector<2x16xf32>
    %20 = arith.addf %19, %18 : vector<2x16xf32>
    %21 = arith.divf %19, %20 : vector<2x16xf32>
    %22 = vector.extract_strided_slice %15 {offsets = [0, 16], sizes = [2, 16], strides = [1, 1]} : vector<2x64xf32> to vector<2x16xf32>
    %23 = arith.negf %22 : vector<2x16xf32>
    %24 = math.exp %23 : vector<2x16xf32>
    %cst_15 = arith.constant 1.000000e+00 : f32
    %25 = vector.broadcast %cst_15 : f32 to vector<2x16xf32>
    %26 = arith.addf %25, %24 : vector<2x16xf32>
    %27 = arith.divf %25, %26 : vector<2x16xf32>
    %28 = vector.extract_strided_slice %15 {offsets = [0, 32], sizes = [2, 16], strides = [1, 1]} : vector<2x64xf32> to vector<2x16xf32>
    %29 = math.tanh %28 : vector<2x16xf32>
    %30 = vector.extract_strided_slice %15 {offsets = [0, 48], sizes = [2, 16], strides = [1, 1]} : vector<2x64xf32> to vector<2x16xf32>
    %31 = arith.negf %30 : vector<2x16xf32>
    %32 = math.exp %31 : vector<2x16xf32>
    %cst_16 = arith.constant 1.000000e+00 : f32
    %33 = vector.broadcast %cst_16 : f32 to vector<2x16xf32>
    %34 = arith.addf %33, %32 : vector<2x16xf32>
    %35 = arith.divf %33, %34 : vector<2x16xf32>
    %36 = arith.mulf %27, %8 : vector<2x16xf32>
    %37 = arith.mulf %21, %29 : vector<2x16xf32>
    %38 = arith.addf %36, %37 : vector<2x16xf32>
    %39 = math.tanh %38 : vector<2x16xf32>
    %40 = arith.mulf %35, %39 : vector<2x16xf32>
    %c0_17 = arith.constant 0 : index
    %c0_18 = arith.constant 0 : index
    %41 = vector.load %arg22[%c0_17, %c0_18] : memref<2x16xf32, #tpu.memory_space<vmem>>, vector<2x16xf32>
    tpu.vector_store %arg22[%c0_17, %c0_18], %40 {strides = array<i32>} : memref<2x16xf32, #tpu.memory_space<vmem>>, vector<2x16xf32>,
    %c0_19 = arith.constant 0 : index
    %c0_20 = arith.constant 0 : index
    %42 = vector.load %arg23[%c0_19, %c0_20] : memref<2x16xf32, #tpu.memory_space<vmem>>, vector<2x16xf32>
    tpu.vector_store %arg23[%c0_19, %c0_20], %38 {strides = array<i32>} : memref<2x16xf32, #tpu.memory_space<vmem>>, vector<2x16xf32>,
    %43 = arith.truncf %40 : vector<2x16xf32> to vector<2x16xbf16>
    %c0_21 = arith.constant 0 : index
    %c0_22 = arith.constant 0 : index
    %44 = vector.load %arg12[%c0_21, %c0_22] : memref<16x32xbf16, #tpu.memory_space<vmem>>, vector<16x32xbf16>
    %cst_23 = arith.constant dense<0.000000e+00> : vector<2x32xf32>
    %45 = tpu.matmul %43, %44, %cst_23 {dimension_numbers = #tpu.dot_dimension_numbers<[1], [0], [0], [1], [0, 0, 1, 1], [], []>} : vector<2x16xbf16>, vector<16x32xbf16>, vector<2x32xf32> -> vector<2x32xf32>
    %c0_24 = arith.constant 0 : index
    %c0_25 = arith.constant 0 : index
    %46 = vector.load %arg24[%c0_24, %c0_25] : memref<2x8xf32, #tpu.memory_space<vmem>>, vector<2x8xf32>
    %47 = vector.shape_cast %46 : vector<2x8xf32> to vector<2x8x1xf32>
    %c0_26 = arith.constant 0 : index
    %c0_27 = arith.constant 0 : index
    %48 = vector.load %arg13[%c0_26, %c0_27] : memref<1x32xf32, #tpu.memory_space<vmem>>, vector<1x32xf32>
    %49 = vector.shape_cast %48 : vector<1x32xf32> to vector<1x1x32xf32>
    %50 = vector.broadcast %47 : vector<2x8x1xf32> to vector<2x8x32xf32>
    %51 = vector.broadcast %49 : vector<1x1x32xf32> to vector<2x8x32xf32>
    %52 = arith.mulf %50, %51 : vector<2x8x32xf32>
    %c0_28 = arith.constant 0 : index
    %c0_29 = arith.constant 0 : index
    %c0_30 = arith.constant 0 : index
    %53 = vector.load %arg25[%c0_28, %c0_29, %c0_30] : memref<2x8x32xbf16, #tpu.memory_space<vmem>>, vector<2x8x32xbf16>
    %54 = arith.extf %53 : vector<2x8x32xbf16> to vector<2x8x32xf32>
    %55 = vector.shape_cast %45 : vector<2x32xf32> to vector<2x1x32xf32>
    %56 = vector.broadcast %55 : vector<2x1x32xf32> to vector<2x8x32xf32>
    %57 = arith.addf %54, %56 : vector<2x8x32xf32>
    %58 = arith.addf %57, %52 : vector<2x8x32xf32>
    %59 = math.tanh %58 : vector<2x8x32xf32>
    %c0_31 = arith.constant 0 : index
    %c0_32 = arith.constant 0 : index
    %60 = vector.load %arg14[%c0_31, %c0_32] : memref<1x32xf32, #tpu.memory_space<vmem>>, vector<1x32xf32>
    %61 = vector.shape_cast %60 : vector<1x32xf32> to vector<1x1x32xf32>
    %62 = vector.broadcast %61 : vector<1x1x32xf32> to vector<2x8x32xf32>
    %63 = arith.mulf %59, %62 : vector<2x8x32xf32>
    %cst_33 = arith.constant dense<0.000000e+00> : vector<2x8xf32>
    %64 = vector.multi_reduction <add>, %63, %cst_33 [2] : vector<2x8x32xf32> to vector<2x8xf32>
    %c0_34 = arith.constant 0 : index
    %c0_35 = arith.constant 0 : index
    %65 = vector.load %arg2[%c0_34, %c0_35] : memref<2x8xf32, #tpu.memory_space<vmem>>, vector<2x8xf32>
    %66 = arith.addf %64, %65 : vector<2x8xf32>
    %cst_36 = arith.constant dense<0xFF800000> : vector<2xf32>
    %67 = vector.multi_reduction <maximumf>, %66, %cst_36 [1] : vector<2x8xf32> to vector<2xf32>
    %68 = vector.shape_cast %67 : vector<2xf32> to vector<2x1xf32>
    %69 = vector.broadcast %68 : vector<2x1xf32> to vector<2x8xf32>
    %70 = arith.subf %66, %69 : vector<2x8xf32>
    %71 = math.exp %70 : vector<2x8xf32>
    %cst_37 = arith.constant dense<0.000000e+00> : vector<2xf32>
    %72 = vector.multi_reduction <add>, %71, %cst_37 [1] : vector<2x8xf32> to vector<2xf32>
    %73 = vector.shape_cast %72 : vector<2xf32> to vector<2x1xf32>
    %74 = tpu.reciprocal %73 {approx = true} : vector<2x1xf32> -> vector<2x1xf32>
    %75 = vector.broadcast %74 : vector<2x1xf32> to vector<2x8xf32>
    %76 = arith.mulf %71, %75 : vector<2x8xf32>
    %77 = vector.shape_cast %76 : vector<2x8xf32> to vector<2x1x8xf32>
    %78 = arith.truncf %77 : vector<2x1x8xf32> to vector<2x1x8xbf16>
    %c0_38 = arith.constant 0 : index
    %c0_39 = arith.constant 0 : index
    %c0_40 = arith.constant 0 : index
    %79 = vector.load %arg1[%c0_38, %c0_39, %c0_40] : memref<2x8x32xbf16, #tpu.memory_space<vmem>>, vector<2x8x32xbf16>
    "tpu.trace_start"() <{level = 10 : i32, message = "bqt,btd->bqd"}> : () -> ()
    %cst_41 = arith.constant dense<0.000000e+00> : vector<2x1x32xf32>
    %80 = tpu.matmul %78, %79, %cst_41 {dimension_numbers = #tpu.dot_dimension_numbers<[2], [1], [1], [2], [0, 0, 0, 1, 1, 2], [0], [0]>} : vector<2x1x8xbf16>, vector<2x8x32xbf16>, vector<2x1x32xf32> -> vector<2x1x32xf32>
    "tpu.trace_stop"() : () -> ()
    %81 = vector.shape_cast %80 : vector<2x1x32xf32> to vector<2x32xf32>
    %82 = tpu.concatenate %40, %81 in 1 : vector<2x16xf32>, vector<2x32xf32> -> vector<2x48xf32>
    %83 = arith.truncf %82 : vector<2x48xf32> to vector<2x48xbf16>
    %c0_42 = arith.constant 0 : index
    %c0_43 = arith.constant 0 : index
    %84 = vector.load %arg15[%c0_42, %c0_43] : memref<48x32xbf16, #tpu.memory_space<vmem>>, vector<48x32xbf16>
    %cst_44 = arith.constant dense<0.000000e+00> : vector<2x32xf32>
    %85 = tpu.matmul %83, %84, %cst_44 {dimension_numbers = #tpu.dot_dimension_numbers<[1], [0], [0], [1], [0, 0, 1, 1], [], []>} : vector<2x48xbf16>, vector<48x32xbf16>, vector<2x32xf32> -> vector<2x32xf32>
    %c0_45 = arith.constant 0 : index
    %c0_46 = arith.constant 0 : index
    %86 = vector.load %arg16[%c0_45, %c0_46] : memref<1x32xf32, #tpu.memory_space<vmem>>, vector<1x32xf32>
    %87 = vector.broadcast %86 : vector<1x32xf32> to vector<2x32xf32>
    %88 = arith.addf %85, %87 : vector<2x32xf32>
    %c0_47 = arith.constant 0 : index
    %c0_48 = arith.constant 0 : index
    %89 = vector.load %arg17[%c0_47, %c0_48] : memref<1x32xf32, #tpu.memory_space<vmem>>, vector<1x32xf32>
    %90 = vector.broadcast %89 : vector<1x32xf32> to vector<2x32xf32>
    %91 = arith.mulf %81, %90 : vector<2x32xf32>
    %cst_49 = arith.constant dense<0.000000e+00> : vector<2xf32>
    %92 = vector.multi_reduction <add>, %91, %cst_49 [1] : vector<2x32xf32> to vector<2xf32>
    %93 = vector.shape_cast %92 : vector<2xf32> to vector<2x1xf32>
    %c0_50 = arith.constant 0 : index
    %c0_51 = arith.constant 0 : index
    %94 = vector.load %arg18[%c0_50, %c0_51] : memref<1x16xf32, #tpu.memory_space<vmem>>, vector<1x16xf32>
    %95 = vector.broadcast %94 : vector<1x16xf32> to vector<2x16xf32>
    %96 = arith.mulf %40, %95 : vector<2x16xf32>
    %cst_52 = arith.constant dense<0.000000e+00> : vector<2xf32>
    %97 = vector.multi_reduction <add>, %96, %cst_52 [1] : vector<2x16xf32> to vector<2xf32>
    %98 = vector.shape_cast %97 : vector<2xf32> to vector<2x1xf32>
    %99 = arith.addf %93, %98 : vector<2x1xf32>
    %c0_53 = arith.constant 0 : index
    %c0_54 = arith.constant 0 : index
    %100 = vector.load %arg19[%c0_53, %c0_54] : memref<1x16xf32, #tpu.memory_space<vmem>>, vector<1x16xf32>
    %101 = vector.broadcast %100 : vector<1x16xf32> to vector<2x16xf32>
    %102 = arith.mulf %4, %101 : vector<2x16xf32>
    %cst_55 = arith.constant dense<0.000000e+00> : vector<2xf32>
    %103 = vector.multi_reduction <add>, %102, %cst_55 [1] : vector<2x16xf32> to vector<2xf32>
    %104 = vector.shape_cast %103 : vector<2xf32> to vector<2x1xf32>
    %105 = arith.addf %99, %104 : vector<2x1xf32>
    %c0_56 = arith.constant 0 : index
    %c0_57 = arith.constant 0 : index
    %106 = vector.load %arg20[%c0_56, %c0_57] : memref<1x1xf32, #tpu.memory_space<vmem>>, vector<1x1xf32>
    %107 = vector.broadcast %106 : vector<1x1xf32> to vector<2x1xf32>
    %108 = arith.addf %105, %107 : vector<2x1xf32>
    %109 = arith.negf %108 : vector<2x1xf32>
    %110 = math.exp %109 : vector<2x1xf32>
    %cst_58 = arith.constant 1.000000e+00 : f32
    %111 = vector.broadcast %cst_58 : f32 to vector<2x1xf32>
    %112 = arith.addf %111, %110 : vector<2x1xf32>
    %113 = arith.divf %111, %112 : vector<2x1xf32>
    %c0_i32_59 = arith.constant 0 : i32
    %114 = vector.broadcast %c0_i32_59 : i32 to vector<2x1xi32>
    %115 = arith.cmpi ne, %6, %114 : vector<2x1xi32>
    %116 = arith.extui %115 : vector<2x1xi1> to vector<2x1xi32>
    %117 = arith.sitofp %116 : vector<2x1xi32> to vector<2x1xf32>
    %c0_i32_60 = arith.constant 0 : i32
    %118 = vector.broadcast %c0_i32_60 : i32 to vector<2x1xi32>
    %119 = arith.cmpi eq, %6, %118 : vector<2x1xi32>
    %c1_i32 = arith.constant 1 : i32
    %120 = vector.broadcast %c1_i32 : i32 to vector<2x1xi32>
    %121 = arith.subi %6, %120 : vector<2x1xi32>
    %c0_i32_61 = arith.constant 0 : i32
    %122 = vector.broadcast %c0_i32_61 : i32 to vector<2x1xi32>
    %123 = arith.select %119, %122, %121 : vector<2x1xi1>, vector<2x1xi32>
    %cst_62 = arith.constant dense<0xFF800000> : vector<2xf32>
    %124 = vector.multi_reduction <maximumf>, %88, %cst_62 [1] : vector<2x32xf32> to vector<2xf32>
    %125 = vector.shape_cast %124 : vector<2xf32> to vector<2x1xf32>
    %126 = vector.broadcast %125 : vector<2x1xf32> to vector<2x32xf32>
    %127 = arith.subf %88, %126 : vector<2x32xf32>
    %128 = math.exp %127 : vector<2x32xf32>
    %cst_63 = arith.constant dense<0.000000e+00> : vector<2xf32>
    %129 = vector.multi_reduction <add>, %128, %cst_63 [1] : vector<2x32xf32> to vector<2xf32>
    %130 = vector.shape_cast %129 : vector<2xf32> to vector<2x1xf32>
    %131 = tpu.reciprocal %130 {approx = true} : vector<2x1xf32> -> vector<2x1xf32>
    %132 = tpu.iota {dimensions = array<i32: 1>} : vector<2x32xi32>
    %133 = vector.broadcast %123 : vector<2x1xi32> to vector<2x32xi32>
    %134 = arith.cmpi eq, %132, %133 : vector<2x32xi32>
    %cst_64 = arith.constant 0.000000e+00 : f32
    %135 = vector.broadcast %cst_64 : f32 to vector<2x32xf32>
    %136 = arith.select %134, %128, %135 : vector<2x32xi1>, vector<2x32xf32>
    %cst_65 = arith.constant dense<0.000000e+00> : vector<2xf32>
    %137 = vector.multi_reduction <add>, %136, %cst_65 [1] : vector<2x32xf32> to vector<2xf32>
    %138 = vector.shape_cast %137 : vector<2xf32> to vector<2x1xf32>
    %139 = arith.mulf %113, %138 : vector<2x1xf32>
    %140 = arith.mulf %139, %131 : vector<2x1xf32>
    %c0_66 = arith.constant 0 : index
    %c0_67 = arith.constant 0 : index
    %141 = vector.load %arg3[%c0_66, %c0_67] : memref<2x8xi32, #tpu.memory_space<vmem>>, vector<2x8xi32>
    %142 = vector.broadcast %123 : vector<2x1xi32> to vector<2x8xi32>
    %143 = arith.cmpi eq, %141, %142 : vector<2x8xi32>
    %cst_68 = arith.constant 0.000000e+00 : f32
    %144 = vector.broadcast %cst_68 : f32 to vector<2x8xf32>
    %145 = arith.select %143, %76, %144 : vector<2x8xi1>, vector<2x8xf32>
    %cst_69 = arith.constant dense<0.000000e+00> : vector<2xf32>
    %146 = vector.multi_reduction <add>, %145, %cst_69 [1] : vector<2x8xf32> to vector<2xf32>
    %147 = vector.shape_cast %146 : vector<2xf32> to vector<2x1xf32>
    %cst_70 = arith.constant 1.000000e+00 : f32
    %148 = vector.broadcast %cst_70 : f32 to vector<2x1xf32>
    %149 = arith.subf %148, %113 : vector<2x1xf32>
    %150 = arith.mulf %149, %147 : vector<2x1xf32>
    %151 = arith.addf %140, %150 : vector<2x1xf32>
    %c0_71 = arith.constant 0 : index
    %c0_72 = arith.constant 0 : index
    %152 = vector.load %arg26[%c0_71, %c0_72] : memref<2x1xf32, #tpu.memory_space<vmem>>, vector<2x1xf32>
    %153 = math.log %151 : vector<2x1xf32>
    %cst_73 = arith.constant 0.000000e+00 : f32
    %154 = vector.broadcast %cst_73 : f32 to vector<2x1xf32>
    %155 = arith.subf %154, %153 : vector<2x1xf32>
    %156 = arith.mulf %155, %117 : vector<2x1xf32>
    %157 = arith.addf %152, %156 : vector<2x1xf32>
    %c0_74 = arith.constant 0 : index
    %c0_75 = arith.constant 0 : index
    %158 = vector.load %arg26[%c0_74, %c0_75] : memref<2x1xf32, #tpu.memory_space<vmem>>, vector<2x1xf32>
    tpu.vector_store %arg26[%c0_74, %c0_75], %157 {strides = array<i32>} : memref<2x1xf32, #tpu.memory_space<vmem>>, vector<2x1xf32>,
    %159 = arith.addf %46, %76 : vector<2x8xf32>
    %c0_76 = arith.constant 0 : index
    %c0_77 = arith.constant 0 : index
    %160 = vector.load %arg24[%c0_76, %c0_77] : memref<2x8xf32, #tpu.memory_space<vmem>>, vector<2x8xf32>
    tpu.vector_store %arg24[%c0_76, %c0_77], %159 {strides = array<i32>} : memref<2x8xf32, #tpu.memory_space<vmem>>, vector<2x8xf32>,
    %c0_78 = arith.constant 0 : index
    %c0_79 = arith.constant 0 : index
    %161 = vector.load %arg27[%c0_78, %c0_79] : memref<2x1xf32, #tpu.memory_space<vmem>>, vector<2x1xf32>
    %162 = arith.minimumf %159, %76 : vector<2x8xf32>
    %cst_80 = arith.constant dense<0.000000e+00> : vector<2xf32>
    %163 = vector.multi_reduction <add>, %162, %cst_80 [1] : vector<2x8xf32> to vector<2xf32>
    %164 = vector.shape_cast %163 : vector<2xf32> to vector<2x1xf32>
    %165 = arith.addf %161, %164 : vector<2x1xf32>
    %c0_81 = arith.constant 0 : index
    %c0_82 = arith.constant 0 : index
    %166 = vector.load %arg27[%c0_81, %c0_82] : memref<2x1xf32, #tpu.memory_space<vmem>>, vector<2x1xf32>
    tpu.vector_store %arg27[%c0_81, %c0_82], %165 {strides = array<i32>} : memref<2x1xf32, #tpu.memory_space<vmem>>, vector<2x1xf32>,
    %c5_i32 = arith.constant 5 : i32
    %167 = arith.cmpi eq, %arg0, %c5_i32 : i32
    %168 = arith.extui %167 : i1 to i32
    %c0_i32_83 = arith.constant 0 : i32
    %169 = arith.cmpi ne, %168, %c0_i32_83 : i32
    scf.if %169 {
      %c0_84 = arith.constant 0 : index
      %c0_85 = arith.constant 0 : index
      %170 = vector.load %arg26[%c0_84, %c0_85] : memref<2x1xf32, #tpu.memory_space<vmem>>, vector<2x1xf32>
      %c0_86 = arith.constant 0 : index
      %c0_87 = arith.constant 0 : index
      %171 = vector.load %arg27[%c0_86, %c0_87] : memref<2x1xf32, #tpu.memory_space<vmem>>, vector<2x1xf32>
      %172 = tpu.concatenate %170, %171 in 1 : vector<2x1xf32>, vector<2x1xf32> -> vector<2x2xf32>
      %c0_88 = arith.constant 0 : index
      %c0_89 = arith.constant 0 : index
      %173 = vector.load %arg21[%c0_88, %c0_89] : memref<2x2xf32, #tpu.memory_space<vmem>>, vector<2x2xf32>
      tpu.vector_store %arg21[%c0_88, %c0_89], %172 {strides = array<i32>} : memref<2x2xf32, #tpu.memory_space<vmem>>, vector<2x2xf32>,
    } else {
    }
    return
  }
  func.func @transform_0(%arg0: i32) -> (i32, i32, i32) {
    %c0_i32 = arith.constant 0 : i32
    %c0_i32_0 = arith.constant 0 : i32
    %c0_i32_1 = arith.constant 0 : i32
    %c0_i32_2 = arith.constant 0 : i32
    return %c0_i32, %c0_i32_0, %c0_i32_1 : i32, i32, i32
  }
  func.func @transform_1(%arg0: i32) -> (i32, i32) {
    %c0_i32 = arith.constant 0 : i32
    %c0_i32_0 = arith.constant 0 : i32
    %c0_i32_1 = arith.constant 0 : i32
    return %c0_i32, %c0_i32_0 : i32, i32
  }
  func.func @transform_2(%arg0: i32) -> (i32, i32) {
    %c0_i32 = arith.constant 0 : i32
    %c0_i32_0 = arith.constant 0 : i32
    %c0_i32_1 = arith.constant 0 : i32
    return %c0_i32, %c0_i32_0 : i32, i32
  }
  func.func @transform_3(%arg0: i32) -> (i32, i32, i32) {
    %c0_i32 = arith.constant 0 : i32
    %c0_i32_0 = arith.constant 0 : i32
    %c0_i32_1 = arith.constant 0 : i32
    return %arg0, %c0_i32, %c0_i32_0 : i32, i32, i32
  }
  func.func @transform_4(%arg0: i32) -> (i32, i32, i32) {
    %c0_i32 = arith.constant 0 : i32
    %c0_i32_0 = arith.constant 0 : i32
    %c0_i32_1 = arith.constant 0 : i32
    return %arg0, %c0_i32, %c0_i32_0 : i32, i32, i32
  }
  func.func @transform_5(%arg0: i32) -> (i32, i32) {
    %c0_i32 = arith.constant 0 : i32
    %c0_i32_0 = arith.constant 0 : i32
    %c0_i32_1 = arith.constant 0 : i32
    return %c0_i32, %c0_i32_0 : i32, i32
  }
  func.func @transform_6(%arg0: i32) -> (i32, i32) {
    %c0_i32 = arith.constant 0 : i32
    %c0_i32_0 = arith.constant 0 : i32
    %c0_i32_1 = arith.constant 0 : i32
    return %c0_i32, %c0_i32_0 : i32, i32
  }
  func.func @transform_7(%arg0: i32) -> (i32, i32) {
    %c0_i32 = arith.constant 0 : i32
    %c0_i32_0 = arith.constant 0 : i32
    %c0_i32_1 = arith.constant 0 : i32
    return %c0_i32, %c0_i32_0 : i32, i32
  }
  func.func @transform_8(%arg0: i32) -> (i32, i32) {
    %c0_i32 = arith.constant 0 : i32
    %c0_i32_0 = arith.constant 0 : i32
    %c0_i32_1 = arith.constant 0 : i32
    return %c0_i32, %c0_i32_0 : i32, i32
  }
  func.func @transform_9(%arg0: i32) -> (i32, i32) {
    %c0_i32 = arith.constant 0 : i32
    %c0_i32_0 = arith.constant 0 : i32
    %c0_i32_1 = arith.constant 0 : i32
    return %c0_i32, %c0_i32_0 : i32, i32
  }
  func.func @transform_10(%arg0: i32) -> (i32, i32) {
    %c0_i32 = arith.constant 0 : i32
    %c0_i32_0 = arith.constant 0 : i32
    %c0_i32_1 = arith.constant 0 : i32
    return %c0_i32, %c0_i32_0 : i32, i32
  }
  func.func @transform_11(%arg0: i32) -> (i32, i32) {
    %c0_i32 = arith.constant 0 : i32
    %c0_i32_0 = arith.constant 0 : i32
    %c0_i32_1 = arith.constant 0 : i32
    return %c0_i32, %c0_i32_0 : i32, i32
  }
  func.func @transform_12(%arg0: i32) -> (i32, i32) {
    %c0_i32 = arith.constant 0 : i32
    %c0_i32_0 = arith.constant 0 : i32
    %c0_i32_1 = arith.constant 0 : i32
    return %c0_i32, %c0_i32_0 : i32, i32
  }
  func.func @transform_13(%arg0: i32) -> (i32, i32) {
    %c0_i32 = arith.constant 0 : i32
    %c0_i32_0 = arith.constant 0 : i32
    %c0_i32_1 = arith.constant 0 : i32
    return %c0_i32, %c0_i32_0 : i32, i32
  }
  func.func @transform_14(%arg0: i32) -> (i32, i32) {
    %c0_i32 = arith.constant 0 : i32
    %c0_i32_0 = arith.constant 0 : i32
    %c0_i32_1 = arith.constant 0 : i32
    return %c0_i32, %c0_i32_0 : i32, i32
  }
  func.func @transform_15(%arg0: i32) -> (i32, i32) {
    %c0_i32 = arith.constant 0 : i32
    %c0_i32_0 = arith.constant 0 : i32
    %c0_i32_1 = arith.constant 0 : i32
    return %c0_i32, %c0_i32_0 : i32, i32
  }
  func.func @transform_16(%arg0: i32) -> (i32, i32) {
    %c0_i32 = arith.constant 0 : i32
    %c0_i32_0 = arith.constant 0 : i32
    %c0_i32_1 = arith.constant 0 : i32
    return %c0_i32, %c0_i32_0 : i32, i32
  }
  func.func @transform_17(%arg0: i32) -> (i32, i32) {
    %c0_i32 = arith.constant 0 : i32
    %c0_i32_0 = arith.constant 0 : i32
    %c0_i32_1 = arith.constant 0 : i32
    return %c0_i32, %c0_i32_0 : i32, i32
  }
  func.func @transform_18(%arg0: i32) -> (i32, i32) {
    %c0_i32 = arith.constant 0 : i32
    %c0_i32_0 = arith.constant 0 : i32
    %c0_i32_1 = arith.constant 0 : i32
    return %c0_i32, %c0_i32_0 : i32, i32
  }
  func.func @transform_19(%arg0: i32) -> (i32, i32) {
    %c0_i32 = arith.constant 0 : i32
    %c0_i32_0 = arith.constant 0 : i32
    %c0_i32_1 = arith.constant 0 : i32
    return %c0_i32, %c0_i32_0 : i32, i32
  }
  func.func @transform_20(%arg0: i32) -> (i32, i32) {
    %c0_i32 = arith.constant 0 : i32
    %c0_i32_0 = arith.constant 0 : i32
    %c0_i32_1 = arith.constant 0 : i32
    return %c0_i32, %c0_i32_0 : i32, i32
  }
}

</mosaic_0001>

<bundles_post_ra>
// kernel: tpu_custom_call.1
= control target key start
LH: loop header
LB: loop body
LE: loop exit
PB: predicated region body
PF: predicated region fallthrough
CT: control target
= control target key end

     0   :  { %s2499_s0 = inlined_call_operand.vmem [shape: bf16[2,8,32], index: 0, kind: input, shape index: {}]   ;;  %s2500_s1 = inlined_call_operand.hbm [shape: f32[2,8], index: 1, kind: input, shape index: {}]   ;;  %s2501_s2 = inlined_call_operand.hbm [shape: s32[2,8], index: 2, kind: input, shape index: {}]   ;;  %s2502_s3 = inlined_call_operand.vmem [shape: f32[6,2,16], index: 3, kind: input, shape index: {}]   ;;  %s2503_s4 = inlined_call_operand.vmem [shape: s32[6,2,1], index: 4, kind: input, shape index: {}]   ;;  %s2504_s5 = inlined_call_operand.hbm [shape: f32[2,16], index: 5, kind: input, shape index: {}]   ;;  %s2505_s6 = inlined_call_operand.hbm [shape: f32[2,16], index: 6, kind: input, shape index: {}]   ;;  %s2506_s7 = inlined_call_operand.vmem [shape: bf16[32,64], index: 7, kind: input, shape index: {}]   ;;  %s2507_s8 = inlined_call_operand.hbm [shape: f32[1,64], index: 8, kind: input, shape index: {}]   ;;  %s2508_s9 = inlined_call_operand.vmem [shape: bf16[32,32], index: 9, kind: input, shape index: {}]   ;;  %s2509_s10 = inlined_call_operand.hbm [shape: f32[1,32], index: 10, kind: input, shape index: {}]   ;;  %s2510_s11 = inlined_call_operand.vmem [shape: bf16[16,32], index: 11, kind: input, shape index: {}]   ;;  %s2511_s12 = inlined_call_operand.vmem [shape: f32[1,32], index: 12, kind: input, shape index: {}]   ;;  %s2512_s13 = inlined_call_operand.vmem [shape: f32[1,32], index: 13, kind: input, shape index: {}]   ;;  %s2513_s14 = inlined_call_operand.vmem [shape: bf16[48,32], index: 14, kind: input, shape index: {}]   ;;  %s2514_s15 = inlined_call_operand.vmem [shape: f32[1,32], index: 15, kind: input, shape index: {}]   ;;  %s2515_s16 = inlined_call_operand.vmem [shape: f32[1,32], index: 16, kind: input, shape index: {}]   ;;  %s2516_s17 = inlined_call_operand.vmem [shape: f32[1,16], index: 17, kind: input, shape index: {}]   ;;  %s2517_s18 = inlined_call_operand.vmem [shape: f32[1,16], index: 18, kind: input, shape index: {}]   ;;  %s2518_s19 = inlined_call_operand.<no memory space> [shape: f32[1,1], index: 19, kind: input, shape index: {}]   ;;  %s2519_s20 = inlined_call_operand.hbm [shape: f32[2,2], index: 20, kind: output, shape index: {}]  }
   0x1   :  { %2523 = sst [smem:[#allocation26_spill]] %s2499_s0  ;;  %v25_v0 = vstv %s2518_s19 }
   0x2   :  { %2524 = sst [smem:[#allocation27_spill]] %s2500_s1  ;;  %26 = vst [vmem:[#allocation8] sm:$0x1] %v25_v0 }
   0x3   :  { %2525 = sst [smem:[#allocation28_spill]] %s2501_s2 }
   0x4   :  { %2526 = sst [smem:[#allocation29_spill]] %s2502_s3 }
   0x5   :  { %2527 = sst [smem:[#allocation30_spill]] %s2503_s4 }
   0x6   :  { %27 = vsyncpa [#allocation10], 0 }
   0x7   :  { %28 = vsyncpa [#allocation13], 0 }
   0x8   :  { %29 = vsyncpa [#allocation16], 0 }
   0x9   :  { %30 = vsyncpa [#allocation19], 0 }
   0xa   :  { %31 = vsyncpa [#allocation11], 0  ;;  %s2200_s23 = smov 0  }
   0xb LB: > { %s2072_s24 = smov [#allocation12]   ;;  %s2206_s25 = sadd.s32 4294967295, %s2070_s23   ;;  %s2070_s23 = sphi %s2200_s23, %s37_s23  }
   0xc   : > { %s520_s2 = sshll.u32 %s2072_s24, 4  ;;  %p1621_p0 = scmp.ge.s32.totalorder %s2070_s23, 1  ;;  %s521_s2 = int_to_ptr.vmem [resolvable:$true] %s520_s2 }
   0xd   : > { %p493_p1 = scmp.lt.s32.totalorder %s2070_s23, 7  ;;  %p2521_p3 = scmp.eq.s32.totalorder %s2206_s25, 0 }
   0xe   : > { %s2073_s3 = smov [#allocation15]   ;;  %s2074_s27 = smov [#allocation9]  }
   0xf   : > { %p2212_p4 = pnand %p1621_p0, %p493_p1  ;;  %s542_s26 = sshll.u32 %s2073_s3, 4  ;;  %s543_s26 = int_to_ptr.vmem [resolvable:$true] %s542_s26 }
  0x10   : > { %s509_s28 = sshll.u32 %s2074_s27, 4  ;;  %s2075_s29 = smov [#allocation14]   ;;  %s2224_s28 = int_to_ptr.vmem [resolvable:$true] %s509_s28 }
  0x11   : > { %s2528_s19 = scalar_select %p2212_p4, 1, 0 }
  0x12   : > { %p1764_p5 = pneg %p2212_p4  ;;  %s531_s30 = sshll.u32 %s2075_s29, 4  ;;  %s2226_s30 = int_to_ptr.vmem [resolvable:$true] %s531_s30 }
  0x13   : > { %s1875_s21 = scalar_lea.vmem %s521_s2, 32  ;;  %p1883_p11 = scmp.lt.s32.totalorder %s521_s2, %s521_s2 }
  0x14   : > { %p2220_p6 = pnand %p2521_p3, %p1764_p5  ;;  %p1876_p8 = scmp.ne.s32.totalorder %s521_s2, %s1875_s21 }
  0x15   : > { %p1884_p12 = scmp.lt.s32.totalorder %s1875_s21, %s1875_s21 }
  0x16   : > { %p2230_p7 = pneg %p2220_p6 }
  0x17   : > { %p1885_p13 = por %p1884_p12, %p1883_p11 }
  0x18   : > { %p1878_p9 = pnand %p1876_p8, %p2230_p7 }
  0x1a   : > { %p1879_p10 = pneg %p1878_p9 }
  0x1c   : > { %p1886_p0 = pnand %p1885_p13, %p1879_p10 }
  0x1e   : > { %1889 = shalt.err (!%p1886_p0)
}
  0x1f   : > { %s2531_s24 = sld [smem:[#allocation28_spill]]  ;;  %s1901_s3 = scalar_lea.vmem %s543_s26, 32 }
  0x20   : > { %p1902_p1 = scmp.ne.s32.totalorder %s543_s26, %s1901_s3  ;;  %p1909_p3 = scmp.lt.s32.totalorder %s543_s26, %s543_s26 }
  0x21   : > { %p1910_p8 = scmp.lt.s32.totalorder %s1901_s3, %s1901_s3 }
  0x22   : > { %p1904_p5 = pnand %p1902_p1, %p2230_p7 }
  0x23   : > { %p1911_p9 = por %p1910_p8, %p1909_p3 }
  0x24   : > { %p1905_p2 = pneg %p1904_p5 }
  0x25   : > { %1770 = dma.hbm_to_vmem [thread:$0]  (!%p2220_p6), %s2531_s24, 32, %s521_s2, [#allocation13]  }
  0x26   : > { %p1912_p4 = pnand %p1911_p9, %p1905_p2 }
  0x28   : > { %1915 = shalt.err (!%p1912_p4)
}
  0x29   : > { %1776 = dma.hbm_to_vmem [thread:$0]  (!%p2220_p6), %s2505_s6, 32, %s543_s26, [#allocation16]  }
  0x2a   : > { %s1927_s2 = scalar_lea.vmem %s2224_s28, 32  ;;  %p1935_p13 = scmp.lt.s32.totalorder %s2224_s28, %s2224_s28 }
  0x2b   : > { %p1928_p10 = scmp.ne.s32.totalorder %s2224_s28, %s1927_s2  ;;  %p1936_p3 = scmp.lt.s32.totalorder %s1927_s2, %s1927_s2 }
  0x2d   : > { %p1930_p11 = pnand %p1928_p10, %p2230_p7  ;;  %p1937_p2 = por %p1936_p3, %p1935_p13 }
  0x2f   : > { %p1931_p12 = pneg %p1930_p11 }
  0x31   : > { %p1938_p4 = pnand %p1937_p2, %p1931_p12 }
  0x33   : > { %1941 = shalt.err (!%p1938_p4)
}
  0x34   : > { %s2532_s22 = sld [smem:[#allocation27_spill]]  ;;  %s1953_s26 = scalar_lea.vmem %s2226_s30, 32 }
  0x35   : > { %p1954_p0 = scmp.ne.s32.totalorder %s2226_s30, %s1953_s26  ;;  %p1961_p8 = scmp.lt.s32.totalorder %s2226_s30, %s2226_s30 }
  0x36   : > { %p1962_p9 = scmp.lt.s32.totalorder %s1953_s26, %s1953_s26 }
  0x37   : > { %p1956_p1 = pnand %p1954_p0, %p2230_p7 }
  0x38   : > { %p1963_p10 = por %p1962_p9, %p1961_p8 }
  0x39   : > { %p1957_p5 = pneg %p1956_p1 }
  0x3a   : > { %1767 = dma.hbm_to_vmem [thread:$0]  (!%p2220_p6), %s2532_s22, 32, %s2224_s28, [#allocation10]  }
  0x3b   : > { %p1964_p11 = pnand %p1963_p10, %p1957_p5 }
  0x3d   : > { %1967 = shalt.err (!%p1964_p11)
}
  0x3e   : > { %1773 = dma.hbm_to_vmem [thread:$0]  (!%p2220_p6), %s2504_s5, 32, %s2226_s30, [#allocation13]  }
  0x3f   : > { %s2076_s28 = smov [#allocation17]   ;;  %s2077_s29 = smov [#allocation18]  }
  0x40   : > { %s556_s27 = sshll.u32 %s2076_s28, 4  ;;  %s570_s2 = sshll.u32 %s2077_s29, 4  ;;  %s557_s27 = int_to_ptr.vmem [resolvable:$true] %s556_s27  ;;  %s571_s2 = int_to_ptr.vmem [resolvable:$true] %s570_s2 }
  0x41   : > { %s1979_s21 = scalar_lea.vmem %s557_s27, 16  ;;  %s1986_s1 = scalar_lea.vmem %s557_s27, 32 }
  0x42   : > { %p1980_p12 = scmp.ne.s32.totalorder %s557_s27, %s1979_s21  ;;  %p1987_p2 = scmp.lt.s32.totalorder %s557_s27, %s557_s27 }
  0x43   : > { %p1988_p4 = scmp.lt.s32.totalorder %s1986_s1, %s1979_s21 }
  0x44   : > { %p1982_p13 = pnand %p1980_p12, %p2230_p7 }
  0x45   : > { %p1989_p0 = por %p1988_p4, %p1987_p2 }
  0x46   : > { %p1983_p3 = pneg %p1982_p13 }
  0x48   : > { %p1990_p1 = pnand %p1989_p0, %p1983_p3 }
  0x4a   : > { %1993 = shalt.err (!%p1990_p1)
}
  0x4b   : > { %1779 = dma.hbm_to_vmem [thread:$0]  (!%p2220_p6), %s2507_s8, 16, %s557_s27, [#allocation16]  }
  0x4c   : > { %s2005_s26 = scalar_lea.vmem %s571_s2, 16  ;;  %s2012_s24 = scalar_lea.vmem %s571_s2, 32 }
  0x4d   : > { %p2006_p5 = scmp.ne.s32.totalorder %s571_s2, %s2005_s26  ;;  %p2013_p10 = scmp.lt.s32.totalorder %s571_s2, %s571_s2 }
  0x4e   : > { %p2014_p11 = scmp.lt.s32.totalorder %s2012_s24, %s2005_s26 }
  0x4f   : > { %p2008_p8 = pnand %p2006_p5, %p2230_p7 }
  0x50   : > { %p2015_p12 = por %p2014_p11, %p2013_p10 }
  0x51   : > { %p2009_p9 = pneg %p2008_p8 }
  0x53   : > { %p2016_p13 = pnand %p2015_p12, %p2009_p9 }
  0x55   : > { %2019 = shalt.err (!%p2016_p13)
}
  0x56   : > { %1782 = dma.hbm_to_vmem [thread:$0]  (!%p2220_p6), %s2509_s10, 16, %s571_s2, [#allocation19]  }
  0x57   : > { %p2533_p3 = scmp.ne.s32.totalorder %s2528_s19, 0 }
  0x58   : > { %p2534_p2 = scmp.eq.s32.totalorder (!%p2533_p3), %s2206_s25, 0 }
  0x59   : > { %624 = sbr.rel (%p2533_p3) target bundleno = 3186 (0xc72), region = 100 }
  0x5e   : > { %2049 = dma.done.wait (%p2534_p2), [#allocation10], 32   ;;  %p2535_p7 = pmov %p2534_p2 }
  0x5f   : > { %p2536_p4 = pmov %p2534_p2 }
  0x60   : > { %2051 = vsyncadd (%p2535_p7), [#allocation10], 4294967264 }
  0x61   : > { %2053 = dma.done.wait (%p2536_p4), [#allocation13], 64   ;;  %p2537_p0 = pmov %p2534_p2 }
  0x63   : > { %2055 = vsyncadd (%p2537_p0), [#allocation13], 4294967232  ;;  %p2538_p1 = pmov %p2537_p0 }
  0x64   : > { %p2539_p6 = pmov %p2537_p0 }
  0x65   : > { %2057 = dma.done.wait (%p2538_p1), [#allocation16], 48  }
  0x66   : > { %2059 = vsyncadd (%p2539_p6), [#allocation16], 4294967248  ;;  %p2540_p5 = pmov %p2537_p0 }
  0x67   : > { %p2541_p8 = pmov %p2537_p0 }
  0x68   : > { %2061 = dma.done.wait (%p2540_p5), [#allocation19], 16  }
  0x69   : > { %2063 = vsyncadd (%p2541_p8), [#allocation19], 4294967280  ;;  %p700_p9 = scmp.lt.s32.totalorder %s2206_s25, 5  ;;  %s2542_s29 = sld [smem:[#allocation29_spill]] }
  0x6a   : > { %s2543_s22 = sld [smem:[#allocation30_spill]]  ;;  %p2544_p10 = scmp.ne.s32.totalorder %s2206_s25, 0 }
  0x6b   : > { %s701_s19 = scalar_select %p700_p9, %s2206_s25, 5 }
  0x6c   : > { %712 = sbr.rel (%p2544_p10) target bundleno = 325 (0x145), region = 128  ;;  %s2545_s0 = sld [smem:[#allocation26_spill]] (!%p2544_p10) }
  0x6d   : > { %s1636_s4 = sshll.u32 %s701_s19, 1 }
  0x6f   : > { %s2309_s2 = scalar_lea.vmem %s2542_s29, %s1636_s4 }
  0x70   : > { %s2314_s30 = scalar_lea.vmem %s2543_s22, %s1636_s4 }
  0x71   : > { %v713_v1 = vld [vmem:[#allocation14] sm:$0x3]  ;;  %vm714_vm0 = vcmask 123904   ;;  %v716_v2 = vld [vmem:[#allocation15] sm:$0x3]  ;;  %vm718_vm1 = vcmask 58368  }
  0x72   : > { %715 = vst.msk [vmem:[#allocation2] sm:$0x3] %vm714_vm0, %v713_v1  ;;  %717 = vst.msk [vmem:[#allocation3] sm:$0x3] %vm714_vm0, %v716_v2  ;;  %vm720_vm2 = vcmask 1024   ;;  %v2078_v3 = vmov 0.0  }
  0x73   : > { %719 = vst.msk [vmem:[#allocation4] sm:$0x3] %vm718_vm1, %v2078_v3  ;;  %1692 = vmatprep.subr.bf16.mxu0 %v2078_v3  ;;  %v1825_v4 = vld [vmem:[%s2508_s9 + $0x8] sm:$0xff]   ;;  %vm2079_vm3 = vmmov 0   ;;  %v1826_v5 = vld [vmem:[%s2508_s9] sm:$0xff]   ;;  %vm753_vm4 = vcmask 261120  }
  0x74   : > { %721 = vst.msk [vmem:[#allocation6] sm:$0x3] %vm720_vm2, %v2078_v3  ;;  %722 = vst.msk [vmem:[#allocation7] sm:$0x3] %vm720_vm2, %v2078_v3  ;;  %1696 = vmatprep.mubr.msk.bf16.mxu0 %vm2079_vm3, %v2078_v3  ;;  %1693 = vmatpush3.bf16.msra.mxu0 %v1825_v4  ;;  %v1827_v6 = vld [vmem:[%s2545_s0] sm:$0xff]   ;;  %vm800_vm5 = vcmask 257024  }
  0x75   : > { %1694 = vmatprep.subr.bf16.mxu0 %v2078_v3  ;;  %v1639_v7 = vld [vmem:[#allocation18] ss:$0 sm:$0xff] }
  0x78   : > { %1695 = vmatpush3.bf16.msra.mxu0 %v1826_v5 }
  0x7b   : > { %1697 = vmatmul.mubr.msk.bf16.vlgmr.msra.gmra.mxu0 %vm753_vm4, %v1827_v6 }
 0x13b   : > { %v791_v8 = vpop.f32.mrf.mxu0 }
 0x13c   : > { %v792_v9 = vadd.f32 %v1639_v7, %v791_v8 }
 0x13d   : > { %v1698_v10 = vpop.f32.mrf.mxu0 }
 0x13e   : > { %v798_v11 = vpack.c.bf16 %v792_v9, %v792_v9 }
 0x13f   : > { %v794_v12 = vpop.f32.mrf.mxu0 }
 0x140   : > { %801 = vst.msk [vmem:[#allocation5] sm:$0xf] %vm800_vm5, %v798_v11  ;;  %v795_v13 = vadd.f32 %v1639_v7, %v794_v12 }
 0x141   : > { %v1699_v14 = vpop.f32.mrf.mxu0 }
 0x142   : > { %v799_v15 = vpack.c.bf16 %v795_v13, %v795_v13 }
 0x144   : > { %802 = vst.msk [vmem:[#allocation5 + $0x4] sm:$0xf] %vm800_vm5, %v799_v15 }
 0x145 PF: > { %v805_v16 = vld [vmem:[#allocation2] sm:$0x3]  ;;  %s2080_s27 = smov 16   ;;  %v2081_v17 = vmov 0.0   ;;  %v1830_v18 = vld [vmem:[%s2506_s7 + $0x8] sm:$0xff]   ;;  %vm2082_vm6 = vmmov 0   ;;  %v976_v44 = vlaneseq }
 0x146   : > { %808 = vrot.lane.b32.xlu0 %v805_v16, %s2080_s27  ;;  %1700 = vmatprep.subr.bf16.mxu0 %v2081_v17  ;;  %v1831_v19 = vld [vmem:[%s2506_s7] sm:$0xff]   ;;  %vm811_vm7 = vcmask 130048   ;;  %vm837_vm8 = vcmask 261120   ;;  %v1644_v25 = vld [vmem:[#allocation17] ss:$0 sm:$0xff]  ;;  %s2084_s3 = smov 32  }
 0x147   : > { %1708 = vmatprep.subr.bf16.mxu1 %v2081_v17  ;;  %1701 = vmatpush3.bf16.msra.mxu0 %v1830_v18  ;;  %v806_v20 = vld [vmem:[#allocation3] sm:$0x3]  ;;  %v2344_v21 = vld [vmem:[%s2309_s2] sm:$0x3]  ;;  %s2083_s2 = smov 96   ;;  %v2360_v45 = vshrl.u32 %v976_v44, 7 }
 0x148   : > { %1704 = vmatprep.mubr.msk.bf16.mxu0 %vm2082_vm6, %v2081_v17  ;;  %1702 = vmatprep.subr.bf16.mxu0 %v2081_v17  ;;  %v1832_v42 = vld [vmem:[%s2510_s11] sm:$0xff]   ;;  %s2085_s28 = smov 80   ;;  %v2086_v55 = vmov 1966171168   ;;  %vm1095_vm9 = vcmask 1041409   ;;  %vm1098_vm10 = vcmask 58368  }
 0x149   : > { %889 = vrot.lane.b32.xlu1 %v806_v20, %s2080_s27  ;;  %1710 = vmatprep.mubr.msk.bf16.mxu1 %vm2082_vm6, %v2081_v17  ;;  %v2362_v46 = vld [vmem:[#allocation4] sm:$0x3]  ;;  %v2365_v47 = vsub.s32 0, %v2360_v45  ;;  %v2372_v51 = vsub.s32 1, %v2360_v45  ;;  %v1005_v56 = vunpack.c.l.s4 %v2086_v55  ;;  %v1651_v63 = vld [vmem:[%s2511_s12] ss:$0 sm:$0xff] }
 0x14a   : > { %1709 = vmatpush3.bf16.msra.mxu1 %v1832_v42  ;;  %v1652_v18 = vld [vmem:[%s2512_s13] ss:$0 sm:$0xff]  ;;  %s2546_s22 = sld [smem:[#allocation26_spill]]  ;;  %vm1172_vm11 = vcmask 1043456   ;;  %vm913_vm12 = vcmask 123904   ;;  %vm1168_vm13 = vcmask 64512  }
 0x14b   : > { %1703 = vmatpush3.bf16.msra.mxu0 %v1831_v19  ;;  %1714 = vmatprep.subr.bf16.mxu1 %v2081_v17  ;;  %v979_v48 = vrot.slane %v2362_v46, %v2365_v47  ;;  %v986_v53 = vrot.slane %v2362_v46, %v2372_v51  ;;  %v1006_v57 = vunpack.c.0.s8 %v1005_v56  ;;  %v1673_v60 = vld [vmem:[#allocation5] sm:$0xff]   ;;  %s2088_s26 = smov 48   ;;  %vm1312_vm14 = vcmask 392192   ;;  %p1667_p11 = scmp.ne.s32.totalorder %s2206_s25, 5 }
 0x14c   : > { %1720 = vmatprep.subr.bf16.mxu0 %v2081_v17  ;;  %v1674_v3 = vunpack.c.l.bf16 %v1673_v60  ;;  %v1675_v9 = vunpack.c.h.bf16 %v1673_v60  ;;  %vm1370_vm0 = vcmask 254976   ;;  %vm1477_vm3 = vcmask 1024   ;;  %s2090_s19 = smov (!%p1667_p11), 1  }
 0x14d   : > { %v1009_v58 = vsub.s32 %v1006_v57, %v2360_v45 }
 0x1b8   : > { %v809_v22 = vpop.permute.xlu0 %808 }
 0x1b9   : > { %v812_v23 = vsel %vm811_vm7, %v2344_v21, %v809_v22 }
 0x1ba   : > { %v813_v24 = vpack.c.bf16 %v812_v23, %v812_v23 }
 0x1bb   : > { %v890_v38 = vpop.permute.xlu1 %889 }
 0x1bc   : > { %1705 = vmatmul.mubr.msk.bf16.vlgmr.msra.gmra.mxu0 %vm837_vm8, %v813_v24 }
 0x1bd   : > { %1722 = vmatprep.mubr.msk.bf16.mxu0 %vm2082_vm6, %v2081_v17 }
 0x27c   : > { %v875_v26 = vpop.f32.mrf.mxu0 }
 0x27d   : > { %v876_v27 = vadd.f32 %v1644_v25, %v875_v26  ;;  %v1057_v26 = vld [vmem:[#allocation9] sm:$0x3] }
 0x27e   : > { %v1706_v28 = vpop.f32.mrf.mxu0 }
 0x27f   : > { %1836 = vtanh.f32 %v876_v27  ;;  %v1648_v32 = vmul.f32 -1.442695, %v876_v27  ;;  %v1069_v27 = vrot.slane %v1057_v26, %v2372_v51  ;;  %v2087_v28 = vmov 0  }
 0x280   : > { %v878_v29 = vpop.f32.mrf.mxu0  ;;  %1828 = vset.pattern.permute.xlu0 %v2087_v28  ;;  %1829 = vset.pattern.permute.xlu1 %v2087_v28 }
 0x281   : > { %1838 = vpow2.f32 %v1648_v32  ;;  %v1062_v29 = vrot.slane %v1057_v26, %v2365_v47 }
 0x282   : > { %v1707_v30 = vpop.f32.mrf.mxu0 }
 0x28c   : > { %v1837_v31 = vpop.eup %1836 }
 0x28d   : > { %894 = vrot.lane.b32.xlu0 %v1837_v31, %s2083_s2 }
 0x28e   : > { %v1839_v33 = vpop.eup %1838 }
 0x28f   : > { %v884_v34 = vadd.f32 1.0, %v1839_v33 }
 0x291   : > { %1840 = vrcp.f32 %v884_v34 }
 0x29e   : > { %v1841_v35 = vpop.eup %1840 }
 0x29f   : > { %v892_v39 = vmul.f32 %v1841_v35, %v890_v38 }
 0x2ff   : > { %v895_v36 = vpop.permute.xlu0 %894 }
 0x300   : > { %v897_v37 = vmul.f32 %v1841_v35, %v895_v36  ;;  %v2396_v36 = vand.u32 127, %v976_v44 }
 0x302   : > { %899 = vrot.lane.b32.xlu1 %v897_v37, %s2080_s27  ;;  %v2400_v37 = vsub.s32 %v2396_v36, %v2360_v45 }
 0x374   : > { %v900_v40 = vpop.permute.xlu1 %899 }
 0x375   : > { %v2352_v41 = vadd.f32 %v900_v40, %v892_v39 }
 0x377   : > { %1842 = vtanh.f32 %v2352_v41 }
 0x384   : > { %v1843_v43 = vpop.eup %1842 }
 0x385   : > { %905 = vrot.lane.b32.xlu0 %v1843_v43, %s2084_s3 }
 0x389   : > { %981 = vbcast.lane.b32.xlu0 %v979_v48, 256 }
 0x3f7   : > { %v906_v49 = vpop.permute.xlu0 %905 }
 0x3f8   : > { %v2369_v50 = vmul.f32 %v1841_v35, %v906_v49 }
 0x3fa   : > { %v920_v52 = vpack.c.bf16 %v2369_v50, %v2369_v50 }
 0x3fb   : > { %v982_v0 = vpop.permute.xlu0 %981 }
 0x3fc   : > { %924 = vrot.lane.b32.xlu1 %v920_v52, %s2085_s28  ;;  %v997_v8 = vmul.f32 %v1651_v63, %v982_v0  ;;  %v1157_v0 = vld [vmem:[%s2546_s22 + $0x4] sm:$0xf] }
 0x400   : > { %988 = vbcast.lane.b32.xlu1 %v986_v53, 256 }
 0x46e   : > { %v925_v54 = vpop.permute.xlu1 %924 }
 0x46f   : > { %1711 = vmatmul.mubr.msk.bf16.vlgmr.msra.gmra.mxu1 %vm811_vm7, %v925_v54 }
 0x470   : > { %1716 = vmatprep.mubr.msk.bf16.mxu1 %vm2082_vm6, %v2081_v17 }
 0x472   : > { %v989_v5 = vpop.permute.xlu1 %988 }
 0x473   : > { %v998_v13 = vmul.f32 %v1651_v63, %v989_v5 }
 0x52f   : > { %v969_v59 = vpop.f32.mrf.mxu1 }
 0x530   : > { %v1010_v61 = vrot.slane %v969_v59, %v1009_v58 }
 0x531   : > { %v1712_v62 = vpop.f32.mrf.mxu1 }
 0x532   : > { %v1011_v1 = vcombine.high %v1010_v61, %v1010_v61  ;;  %v1018_v2 = vrot.slane %v1010_v61, %v1009_v58 }
 0x533   : > { %v972_v4 = vpop.f32.mrf.mxu1 }
 0x534   : > { %v1025_v6 = vrot.slane %v1011_v1, %v1009_v58  ;;  %v1029_v7 = vrot.slane %v1018_v2, %v2365_v47  ;;  %v1156_v1 = vld [vmem:[%s2546_s22] sm:$0xf]  ;;  %v1230_v2 = vsel %vm1172_vm11, %v1157_v0, 0 }
 0x535   : > { %v1713_v10 = vpop.f32.mrf.mxu1  ;;  %1721 = vmatpush3.bf16.msra.mxu0 %v1230_v2 }
 0x536   : > { %v1036_v11 = vadd.f32 %v1674_v3, %v1029_v7  ;;  %v1033_v12 = vrot.slane %v1025_v6, %v2365_v47  ;;  %v1174_v3 = vsel %vm1172_vm11, %v1156_v1, 0 }
 0x537   : > { %1715 = vmatpush3.bf16.msra.mxu1 %v1174_v3 }
 0x538   : > { %v1038_v14 = vadd.f32 %v1036_v11, %v997_v8  ;;  %v1037_v15 = vadd.f32 %v1675_v9, %v1033_v12  ;;  %1726 = vmatprep.subr.bf16.mxu1 %v2081_v17 }
 0x53a   : > { %1844 = vtanh.f32 %v1038_v14  ;;  %v1039_v16 = vadd.f32 %v1037_v15, %v998_v13 }
 0x53c   : > { %1846 = vtanh.f32 %v1039_v16 }
 0x547   : > { %v1845_v19 = vpop.eup %1844 }
 0x548   : > { %v1049_v20 = vmul.f32 %v1845_v19, %v1652_v18 }
 0x549   : > { %v1847_v22 = vpop.eup %1846 }
 0x54a   : > { %v1051_v23 = vsel %vm837_vm8, %v1049_v20, 0.0  ;;  %v1050_v24 = vmul.f32 %v1847_v22, %v1652_v18  ;;  %v1833_v20 = vld [vmem:[%s2513_s14 + $0x10] sm:$0xff]   ;;  %v1834_v22 = vld [vmem:[%s2513_s14 + $0x8] sm:$0xff]  }
 0x54b   : > { %1052 = vadd.xlane.f32.xlu0 %v1051_v23  ;;  %v1835_v23 = vld [vmem:[%s2513_s14] sm:$0xff]  }
 0x54c   : > { %v1054_v25 = vsel %vm837_vm8, %v1050_v24, 0.0  ;;  %v1660_v24 = vld [vmem:[%s2515_s16] ss:$0 sm:$0xff] }
 0x54d   : > { %1055 = vadd.xlane.f32.xlu1 %v1054_v25 }
 0x55e   : > { %1071 = vbcast.lane.b32.xlu1 %v1069_v27, 256 }
 0x561   : > { %1064 = vbcast.lane.b32.xlu0 %v1062_v29, 256 }
 0x5d4   : > { %v1053_v30 = vpop.xlane.xlu0 %1052 }
 0x5d6   : > { %v1056_v31 = vpop.xlane.xlu1 %1055 }
 0x5d8   : > { %v1065_v32 = vpop.permute.xlu0 %1064 }
 0x5d9   : > { %v1075_v33 = vadd.f32 %v1065_v32, %v1053_v30 }
 0x5da   : > { %v1072_v34 = vpop.permute.xlu1 %1071 }
 0x5db   : > { %v1076_v35 = vadd.f32 %v1072_v34, %v1056_v31  ;;  %1080 = vperm.xlu0 %1828, %v1075_v33  }
 0x5dd   : > { %1083 = vperm.xlu1 %1829, %v1076_v35  }
 0x656   : > { %v1081_v38 = vpop.permute.xlu0 %1080 }
 0x657   : > { %v1090_v40 = vrot.slane %v1081_v38, %v2400_v37  ;;  %v1661_v38 = vld [vmem:[%s2516_s17] ss:$0 sm:$0xff] }
 0x658   : > { %v1084_v39 = vpop.permute.xlu1 %1083 }
 0x659   : > { %v1094_v42 = vrot.slane %v1084_v39, %v2400_v37 }
 0x65b   : > { %v1096_v43 = vsel %vm1095_vm9, %v1094_v42, %v1090_v40 }
 0x65c   : > { %v1099_v48 = vsel %vm1098_vm10, %v1096_v43, -inf }
 0x65d   : > { %1100 = vmax.xlane.f32.xlu1 %v1099_v48 }
 0x6e6   : > { %v1101_v49 = vpop.xlane.xlu1 %1100 }
 0x6e7   : > { %v1106_v44 = vrot.slane %v1101_v49, %v2365_v47  ;;  %v1110_v52 = vrot.slane %v1101_v49, %v2372_v51  ;;  %v2450_v49 = vld [vmem:[%s2314_s30] sm:$0x3]  ;;  %s2089_s30 = smov 112  }
 0x6e8   : > { %vm1421_vm15 = vcmp.eq.s32.totalorder %v2450_v49, 0  ;;  %vm1418_vm4 = vcmp.ne.s32.totalorder %v2450_v49, 0 }
 0x6e9   : > { %v1113_v45 = vsub.f32 %v1075_v33, %v1106_v44  ;;  %v1114_v53 = vsub.f32 %v1076_v35, %v1110_v52 }
 0x6eb   : > { %v1115_v54 = vmul.f32 1.442695, %v1113_v45  ;;  %v1117_v55 = vmul.f32 1.442695, %v1114_v53  ;;  %v1666_v45 = vadd.s32 4294967295, %v2450_v49 }
 0x6ed   : > { %1848 = vpow2.f32 %v1115_v54  ;;  %v1423_v54 = vsel %vm1421_vm15, 0, %v1666_v45 }
 0x6ee   : > { %1850 = vpow2.f32 %v1117_v55 }
 0x6fa   : > { %v1849_v56 = vpop.eup %1848 }
 0x6fb   : > { %1122 = vperm.xlu0 %1828, %v1849_v56   ;;  %v1851_v57 = vpop.eup %1850 }
 0x6ff   : > { %1125 = vperm.xlu0 %1828, %v1851_v57  }
 0x776   : > { %v1123_v58 = vpop.permute.xlu0 %1122 }
 0x777   : > { %v1130_v60 = vrot.slane %v1123_v58, %v2400_v37 }
 0x77a   : > { %v1126_v59 = vpop.permute.xlu0 %1125 }
 0x77b   : > { %v1134_v61 = vrot.slane %v1126_v59, %v2400_v37  ;;  %v1444_v59 = vld [vmem:[#allocation12] sm:$0x3] }
 0x77d   : > { %v1135_v62 = vsel %vm1095_vm9, %v1134_v61, %v1130_v60 }
 0x77e   : > { %v1137_v63 = vsel %vm1098_vm10, %v1135_v62, 0.0 }
 0x77f   : > { %1138 = vadd.xlane.f32.xlu0 %v1137_v63 }
 0x808   : > { %v1139_v4 = vpop.xlane.xlu0 %1138 }
 0x809   : > { %1852 = vrcp.f32 %v1139_v4 }
 0x816   : > { %v1853_v5 = vpop.eup %1852 }
 0x817   : > { %v1149_v6 = vrot.slane %v1853_v5, %v2372_v51  ;;  %v1145_v7 = vrot.slane %v1853_v5, %v2365_v47 }
 0x819   : > { %v1153_v8 = vmul.f32 %v1851_v57, %v1149_v6  ;;  %v1152_v9 = vmul.f32 %v1849_v56, %v1145_v7  ;;  %v1662_v6 = vld [vmem:[%s2517_s18] ss:$0 sm:$0xff] }
 0x81b   : > { %v1155_v10 = vpack.c.bf16 %v1153_v8, %v1153_v8  ;;  %v1154_v11 = vpack.c.bf16 %v1152_v9, %v1152_v9 }
 0x81d   : > { %v1217_v12 = vunpack.c.l.b16 %v1155_v10  ;;  %v1159_v13 = vunpack.c.l.b16 %v1154_v11 }
 0x81f   : > { %1219 = vperm.xlu1 %1829, %v1217_v12   ;;  %1161 = vperm.xlu0 %1828, %v1159_v13  }
 0x823   : > { %910 = vrot.lane.b32.xlu1 %v2369_v50, %s2085_s28 }
 0x89a   : > { %v1220_v14 = vpop.permute.xlu1 %1219  ;;  %v1162_v15 = vpop.permute.xlu0 %1161 }
 0x89b   : > { %v1224_v16 = vrot.slane %v1220_v14, %v2400_v37  ;;  %v1166_v18 = vrot.slane %v1162_v15, %v2400_v37 }
 0x89d   : > { %v1225_v47 = vpack.c.b16 %v1224_v16, %v1224_v16  ;;  %v1167_v51 = vpack.c.b16 %v1166_v18, %v1166_v18 }
 0x89e   : > { %v911_v19 = vpop.permute.xlu1 %910 }
 0x89f   : > { %914 = vst.msk [vmem:[#allocation2] sm:$0x3] %vm913_vm12, %v911_v19  ;;  %1717 = vmatmul.mubr.msk.bf16.vlgmr.msra.gmra.mxu1 %vm1168_vm13, %v1167_v51  ;;  %1723 = vmatmul.mubr.msk.bf16.vlgmr.msra.gmra.mxu0 %vm1168_vm13, %v1225_v47 }
 0x8a0   : > { %1732 = vmatprep.mubr.msk.bf16.mxu1 %vm2082_vm6, %v2081_v17  ;;  %1727 = vmatpush3.bf16.msra.mxu1 %v1833_v20 }
 0x8a1   : > { %1728 = vmatprep.subr.bf16.mxu1 %v2081_v17 }
 0x8a4   : > { %1729 = vmatpush3.bf16.msra.mxu1 %v1834_v22 }
 0x8a5   : > { %1730 = vmatprep.subr.bf16.mxu1 %v2081_v17 }
 0x8a8   : > { %1731 = vmatpush3.bf16.msra.mxu1 %v1835_v23 }
 0x95f   : > { %v1210_v25 = vpop.f32.mrf.mxu1  ;;  %v1266_v26 = vpop.f32.mrf.mxu0 }
 0x960   : > { %v1274_v27 = vrot.slane %v1266_v26, 7  ;;  %v1364_v28 = vmul.f32 %v1660_v24, %v1266_v26  ;;  %v1363_v31 = vmul.f32 %v1660_v24, %v1210_v25  ;;  %v1663_v24 = vld [vmem:[#allocation8] ss:$0 sm:$0xff] }
 0x961   : > { %v1718_v29 = vpop.f32.mrf.mxu1  ;;  %v1724_v30 = vpop.f32.mrf.mxu0 }
 0x962   : > { %v1367_v32 = vrot.slane %v1364_v28, 7  ;;  %v1275_v33 = vsel %vm1095_vm9, %v1274_v27, %v1210_v25 }
 0x963   : > { %v1213_v34 = vpop.f32.mrf.mxu1  ;;  %1276 = vrot.lane.b32.xlu1 %v1275_v33, %s2080_s27  ;;  %v1269_v35 = vpop.f32.mrf.mxu0 }
 0x964   : > { %v1368_v39 = vsel %vm1095_vm9, %v1367_v32, %v1363_v31  ;;  %v1481_v32 = vld [vmem:[#allocation7] sm:$0x3] }
 0x965   : > { %v1719_v40 = vpop.f32.mrf.mxu1  ;;  %v1725_v42 = vpop.f32.mrf.mxu0  ;;  %v1371_v55 = vsel %vm1370_vm0, %v1368_v39, 0.0 }
 0x967   : > { %1380 = vrot.lane.b32.xlu1 %v1661_v38, %s2088_s26 }
 0x9d5   : > { %v1277_v43 = vpop.permute.xlu1 %1276 }
 0x9d6   : > { %v1279_v48 = vsel %vm811_vm7, %v911_v19, %v1277_v43 }
 0x9d7   : > { %v1280_v44 = vpack.c.bf16 %v1279_v48, %v1279_v48 }
 0x9d9   : > { %1733 = vmatmul.mubr.msk.bf16.vlgmr.msra.gmra.mxu1 %vm1312_vm14, %v1280_v44  ;;  %v1381_v52 = vpop.permute.xlu1 %1380 }
 0x9da   : > { %v1383_v53 = vmul.f32 %v1381_v52, %v2369_v50  ;;  %v1665_v52 = vsel %vm1418_vm4, 1.0, %v2081_v17 }
 0x9dc   : > { %1385 = vrot.lane.b32.xlu1 %v1383_v53, %s2085_s28  ;;  %v1471_v53 = vld [vmem:[#allocation6] sm:$0x3] }
 0x9e0   : > { %1435 = vperm.xlu1 %1829, %v1423_v54  }
 0x9e4   : > { %1449 = vperm.xlu1 %1829, %v1152_v9  }
 0x9e8   : > { %1452 = vperm.xlu1 %1829, %v1153_v8   ;;  %v1399_v8 = vmul.f32 %v1662_v6, %v2344_v21 }
 0x9ea   : > { %v1400_v11 = vsel %vm913_vm12, %v1399_v8, 0.0 }
 0xa0c   : > { %1372 = vadd.xlane.f32.xlu1 %v1371_v55 }
 0xa1d   : > { %916 = vrot.lane.b32.xlu1 %v2352_v41, %s2089_s30  ;;  %v1655_v41 = vld [vmem:[%s2514_s15] ss:$0 sm:$0xff] }
 0xa4e   : > { %v1386_v56 = vpop.permute.xlu1 %1385 }
 0xa4f   : > { %v1388_v10 = vsel %vm913_vm12, %v1386_v56, 0.0 }
 0xa5b   : > { %v1436_v57 = vpop.permute.xlu1 %1435 }
 0xa5c   : > { %vm1445_vm1 = vcmp.eq.s32.totalorder %v1444_v59, %v1436_v57  ;;  %vm1437_vm2 = vcmp.eq.s32.totalorder %v2396_v36, %v1436_v57 }
 0xa5f   : > { %v1450_v58 = vpop.permute.xlu1 %1449 }
 0xa60   : > { %v1457_v60 = vrot.slane %v1450_v58, %v2400_v37 }
 0xa63   : > { %v1453_v50 = vpop.permute.xlu1 %1452 }
 0xa64   : > { %v1461_v61 = vrot.slane %v1453_v50, %v2400_v37 }
 0xa66   : > { %v1462_v62 = vsel %vm1095_vm9, %v1461_v61, %v1457_v60 }
 0xa67   : > { %v1464_v63 = vsel %vm1445_vm1, %v1462_v62, 0.0  ;;  %v1479_v0 = vadd.f32 %v1462_v62, %v2362_v46 }
 0xa68   : > { %v1465_v47 = vsel %vm1098_vm10, %v1464_v63, 0.0 }
 0xa69   : > { %1480 = vst.msk [vmem:[#allocation4] sm:$0x3] %vm1098_vm10, %v1479_v0  ;;  %v1482_v1 = vmin.f32 %v1479_v0, %v1462_v62 }
 0xa6b   : > { %v1483_v51 = vsel %vm1098_vm10, %v1482_v1, 0.0 }
 0xa95   : > { %v1373_v2 = vpop.xlane.xlu1 %1372 }
 0xa99   : > { %v1350_v3 = vpop.f32.mrf.mxu1  ;;  %v917_v4 = vpop.permute.xlu1 %916 }
 0xa9a   : > { %v1351_v5 = vadd.f32 %v1655_v41, %v1350_v3  ;;  %919 = vst.msk [vmem:[#allocation3] sm:$0x3] %vm913_vm12, %v917_v4 }
 0xa9b   : > { %v1734_v37 = vpop.f32.mrf.mxu1 }
 0xa9c   : > { %v1424_v46 = vsel %vm1370_vm0, %v1351_v5, -inf }
 0xa9d   : > { %1425 = vmax.xlane.f32.xlu0 %v1424_v46  ;;  %v1353_v7 = vpop.f32.mrf.mxu1 }
 0xa9f   : > { %v1735_v9 = vpop.f32.mrf.mxu1 }
 0xaa1   : > { %1389 = vadd.xlane.f32.xlu0 %v1388_v10 }
 0xaa5   : > { %1401 = vadd.xlane.f32.xlu0 %v1400_v11 }
 0xb26   : > { %v1426_v12 = vpop.xlane.xlu0 %1425 }
 0xb27   : > { %v1427_v13 = vsub.f32 %v1351_v5, %v1426_v12 }
 0xb29   : > { %v1428_v14 = vmul.f32 1.442695, %v1427_v13 }
 0xb2a   : > { %v1390_v19 = vpop.xlane.xlu0 %1389 }
 0xb2b   : > { %1854 = vpow2.f32 %v1428_v14  ;;  %v1391_v22 = vadd.f32 %v1390_v19, %v1373_v2 }
 0xb2e   : > { %v1402_v20 = vpop.xlane.xlu0 %1401 }
 0xb2f   : > { %v1403_v23 = vadd.f32 %v1402_v20, %v1391_v22 }
 0xb31   : > { %v1411_v25 = vadd.f32 %v1663_v24, %v1403_v23 }
 0xb33   : > { %v1664_v36 = vmul.f32 -1.442695, %v1411_v25 }
 0xb35   : > { %1856 = vpow2.f32 %v1664_v36 }
 0xb38   : > { %v1855_v15 = vpop.eup %1854 }
 0xb39   : > { %v1430_v16 = vsel %vm1370_vm0, %v1855_v15, 0.0  ;;  %v1438_v18 = vsel %vm1437_vm2, %v1855_v15, 0.0 }
 0xb3a   : > { %1431 = vadd.xlane.f32.xlu0 %v1430_v16  ;;  %v1439_v21 = vsel %vm1370_vm0, %v1438_v18, 0.0 }
 0xb3e   : > { %1440 = vadd.xlane.f32.xlu0 %v1439_v21 }
 0xb42   : > { %1466 = vadd.xlane.f32.xlu0 %v1465_v47  ;;  %v1857_v26 = vpop.eup %1856 }
 0xb43   : > { %v1415_v27 = vadd.f32 1.0, %v1857_v26 }
 0xb45   : > { %1858 = vrcp.f32 %v1415_v27 }
 0xb46   : > { %1484 = vadd.xlane.f32.xlu0 %v1483_v51 }
 0xb52   : > { %v1859_v31 = vpop.eup %1858 }
 0xb53   : > { %v1468_v35 = vsub.f32 1.0, %v1859_v31 }
 0xbc3   : > { %v1432_v28 = vpop.xlane.xlu0 %1431 }
 0xbc4   : > { %1860 = vrcp.f32 %v1432_v28 }
 0xbc7   : > { %v1441_v29 = vpop.xlane.xlu0 %1440 }
 0xbc8   : > { %v1442_v34 = vmul.f32 %v1859_v31, %v1441_v29 }
 0xbcb   : > { %v1467_v30 = vpop.xlane.xlu0 %1466 }
 0xbcc   : > { %v1469_v42 = vmul.f32 %v1468_v35, %v1467_v30 }
 0xbcf   : > { %v1485_v33 = vpop.xlane.xlu0 %1484 }
 0xbd0   : > { %v1486_v38 = vadd.f32 %v1485_v33, %v1481_v32 }
 0xbd1   : > { %v1861_v39 = vpop.eup %1860 }
 0xbd2   : > { %v1443_v40 = vmul.f32 %v1861_v39, %v1442_v34  ;;  %1487 = vst.msk [vmem:[#allocation7] sm:$0x3] %vm1477_vm3, %v1486_v38 }
 0xbd4   : > { %v1470_v43 = vadd.f32 %v1469_v42, %v1443_v40 }
 0xbd6   : > { %1862 = vlog2.f32 %v1470_v43 }
 0xbe3   : > { %v1863_v48 = vpop.eup %1862 }
 0xbe4   : > { %v1473_v44 = vmul.f32 0.6931472, %v1863_v48 }
 0xbe6   : > { %v1474_v45 = vsub.f32 0.0, %v1473_v44 }
 0xbe8   : > { %v1475_v54 = vmul.f32 %v1665_v52, %v1474_v45  ;;  %1491 = sbr.rel (%p1667_p11) target bundleno = 3171 (0xc63), region = 132 }
 0xbea   : > { %v1476_v55 = vadd.f32 %v1475_v54, %v1471_v53 }
 0xbec   : > { %1478 = vst.msk [vmem:[#allocation6] sm:$0x3] %vm1477_vm3, %v1476_v55 }
 0xbed   : > { %v1493_v56 = vld [vmem:[#allocation7] sm:$0x3]  ;;  %vm1498_vm5 = vcmask 7168   ;;  %vm1500_vm6 = vcmask 9216  }
 0xbee   : > { %1495 = vrot.lane.b32.xlu0 %v1493_v56, %s2090_s19 }
 0xbf3   : > { %v1492_v57 = vld [vmem:[#allocation6] sm:$0x3] }
 0xc60   : > { %v1496_v49 = vpop.permute.xlu0 %1495 }
 0xc61   : > { %v1499_v58 = vsel %vm1498_vm5, %v1492_v57, %v1496_v49 }
 0xc62   : > { %1501 = vst.msk [vmem:[#allocation20] sm:$0x3] %vm1500_vm6, %v1499_v58 }
 0xc63 PF: > { %p1795_p12 = scmp.eq.s32.totalorder %s2206_s25, 5  ;;  %s2091_s4 = smov [#allocation20]  }
 0xc64   : > { %s1509_s0 = sshll.u32 %s2091_s4, 4  ;;  %s1510_s0 = int_to_ptr.vmem [resolvable:$true] %s1509_s0 }
 0xc65   : > { %s2020_s29 = scalar_lea.vmem %s1510_s0, 32  ;;  %p2027_p7 = scmp.lt.s32.totalorder %s1510_s0, %s1510_s0 }
 0xc66   : > { %p2021_p13 = scmp.ne.s32.totalorder %s1510_s0, %s2020_s29  ;;  %p2028_p4 = scmp.lt.s32.totalorder %s2020_s29, %s2020_s29 }
 0xc68   : > { %p2022_p3 = pnand %p2021_p13, %p1795_p12  ;;  %p2029_p0 = por %p2028_p4, %p2027_p7 }
 0xc6a   : > { %p2023_p2 = pneg %p2022_p3 }
 0xc6c   : > { %p2030_p1 = pnand %p2029_p0, %p2023_p2 }
 0xc6e   : > { %2033 = shalt.err (!%p2030_p1)
}
 0xc6f   : > { %1761 = dma.vmem_to_hbm [thread:$0]  (%p1795_p12), %s1510_s0, 32, %s2519_s20, [#allocation11]  }
 0xc70   : > { %2065 = dma.done.wait (%p1795_p12), [#allocation11], 32  }
 0xc71   : > { %2067 = vsyncadd (%p1795_p12), [#allocation11], 4294967264 }
 0xc72 PF: > { %s37_s23 = sadd.s32 1, %s2070_s23  }
 0xc73   : > { %p34_p6 = scmp.ge.s32.totalorder %s37_s23, 8  }
 0xc75   :  { %36 = sbr.rel (!%p34_p6) target bundleno = 11 (0xb), region = 163 }
 0xc7a   :  { %1522 = vsyncpa [#allocation10], 1 }
 0xc7b   :  { %1524 = vsyncpa [#allocation10 + $0x1], 1 }
 0xc7c   :  { %1525 = vsyncpa [#allocation13], 1 }
 0xc7d   :  { %1526 = vsyncpa [#allocation16], 1 }
 0xc7e   :  { %1527 = vsyncpa [#allocation19], 1 }
 0xc7f   :  { %1528 = vsyncpa [#allocation11], 1 }
 0xc80   :  { %1530 = vsyncpa [#allocation11 + $0x1], 1 }

</bundles_post_ra>
